<compile_context>
chip_gen: v7x
topology: tpu7x:2x2x1
jax: 0.10.0
libtpu: 0.0.40
codegen_flags: <defaults>
</compile_context>

<pallas_src>
import functools

import jax
import jax.numpy as jnp
from jax.experimental import pallas as pl
from jax.experimental.pallas import tpu as pltpu


# ---------------------------------------------------------------------------
# tiling helpers
# ---------------------------------------------------------------------------

def _round_up(x, m):
    return ((x + m - 1) // m) * m


def _row_tiling(m, target_tm=256):
    """Pick (padded_rows, row_tile): large, 8-aligned, padded_rows % tile == 0."""
    if m <= target_tm:
        mp = _round_up(m, 8)
        return mp, mp
    mp = _round_up(m, target_tm)
    return mp, target_tm


def _pad_rows(x, mp):
    m = x.shape[0]
    return x if m == mp else jnp.pad(x, ((0, mp - m), (0, 0)))


def _pick_tile(dim, target, align):
    """Largest tile <= target that is a multiple of `align` and divides `dim`;
    falls back to the full dim (a full-extent block is always legal)."""
    if dim <= target:
        return dim
    t = (target // align) * align
    while t >= align:
        if dim % t == 0:
            return t
        t -= align
    return dim


def _pick_heads_per_group(heads, head_dim):
    """Heads packed per attention grid step so the block last dim is a multiple
    of 128 (lane-dense loads/stores).  Returns None if no such packing exists."""
    cands = [hp for hp in range(1, heads + 1)
             if heads % hp == 0 and (hp * head_dim) % 128 == 0]
    if not cands:
        return None
    under = [hp for hp in cands if hp * head_dim <= 512]
    return max(under) if under else min(cands)


# ---------------------------------------------------------------------------
# generic tiled matmul (used by fallback paths)
# ---------------------------------------------------------------------------

def _matmul_kernel(x_ref, w_ref, b_ref, o_ref, acc_ref, *, activation):
    @pl.when(pl.program_id(2) == 0)
    def _():
        acc_ref[...] = jnp.zeros_like(acc_ref)

    acc_ref[...] += jnp.dot(x_ref[...], w_ref[...],
                            preferred_element_type=jnp.float32)

    @pl.when(pl.program_id(2) == pl.num_programs(2) - 1)
    def _():
        acc = acc_ref[...] + b_ref[...]
        if activation == "relu":
            acc = jnp.maximum(acc, 0.0)
        o_ref[...] = acc.astype(o_ref.dtype)


def matmul_pallas(x, w, b=None, activation=None, out_dtype=jnp.bfloat16,
                  target_tm=256, target_tn=512, target_tk=512):
    """y = act(x @ w + b).  x: (M, K), w: (K, N).  bf16 MXU inputs, f32 accumulation."""
    m, k_dim = x.shape
    n = w.shape[1]
    mp, tm = _row_tiling(m, target_tm)
    tn = _pick_tile(n, target_tn, 128)
    tk = _pick_tile(k_dim, target_tk, 128)
    xp = _pad_rows(x.astype(jnp.bfloat16), mp)
    b2 = (jnp.zeros((1, n), jnp.float32) if b is None
          else b.reshape(1, n).astype(jnp.float32))

    out = pl.pallas_call(
        functools.partial(_matmul_kernel, activation=activation),
        out_shape=jax.ShapeDtypeStruct((mp, n), out_dtype),
        grid=(mp // tm, n // tn, k_dim // tk),
        in_specs=[
            pl.BlockSpec((tm, tk), lambda i, j, kk: (i, kk)),
            pl.BlockSpec((tk, tn), lambda i, j, kk: (kk, j)),
            pl.BlockSpec((1, tn), lambda i, j, kk: (0, j)),
        ],
        out_specs=pl.BlockSpec((tm, tn), lambda i, j, kk: (i, j)),
        scratch_shapes=[pltpu.VMEM((tm, tn), jnp.float32)],
        compiler_params=pltpu.CompilerParams(
            dimension_semantics=("parallel", "parallel", "arbitrary")),
    )(xp, w.astype(jnp.bfloat16), b2)
    return out[:m] if mp != m else out


# ---------------------------------------------------------------------------
# fused matmul -> +bias -> +residual -> LayerNorm (attention output projection)
# ---------------------------------------------------------------------------

def _matmul_res_ln_kernel(x_ref, w_ref, b_ref, r_ref, g_ref, bt_ref, o_ref,
                          acc_ref, *, eps):
    @pl.when(pl.program_id(1) == 0)
    def _():
        acc_ref[...] = jnp.zeros_like(acc_ref)

    acc_ref[...] += jnp.dot(x_ref[...], w_ref[...],
                            preferred_element_type=jnp.float32)

    @pl.when(pl.program_id(1) == pl.num_programs(1) - 1)
    def _():
        y = acc_ref[...] + b_ref[...] + r_ref[...].astype(jnp.float32)
        mu = jnp.mean(y, axis=-1, keepdims=True)
        d = y - mu
        var = jnp.mean(d * d, axis=-1, keepdims=True)
        yn = d * jax.lax.rsqrt(var + eps)
        o_ref[...] = (yn * g_ref[...] + bt_ref[...]).astype(o_ref.dtype)


def matmul_add_ln_pallas(x, w, b, res, gamma, beta, eps=1e-5,
                         out_dtype=jnp.bfloat16, target_tm=256, target_tk=512):
    """LayerNorm((x @ w + b) + res) over the last dim.  N (=emb) kept whole so the
    LayerNorm reduction stays inside one output block."""
    m, k_dim = x.shape
    n = w.shape[1]
    mp, tm = _row_tiling(m, target_tm)
    tk = _pick_tile(k_dim, target_tk, 128)
    xp = _pad_rows(x.astype(jnp.bfloat16), mp)
    rp = _pad_rows(res.astype(jnp.bfloat16), mp)

    out = pl.pallas_call(
        functools.partial(_matmul_res_ln_kernel, eps=eps),
        out_shape=jax.ShapeDtypeStruct((mp, n), out_dtype),
        grid=(mp // tm, k_dim // tk),
        in_specs=[
            pl.BlockSpec((tm, tk), lambda i, kk: (i, kk)),
            pl.BlockSpec((tk, n), lambda i, kk: (kk, 0)),
            pl.BlockSpec((1, n), lambda i, kk: (0, 0)),
            pl.BlockSpec((tm, n), lambda i, kk: (i, 0)),
            pl.BlockSpec((1, n), lambda i, kk: (0, 0)),
            pl.BlockSpec((1, n), lambda i, kk: (0, 0)),
        ],
        out_specs=pl.BlockSpec((tm, n), lambda i, kk: (i, 0)),
        scratch_shapes=[pltpu.VMEM((tm, n), jnp.float32)],
        compiler_params=pltpu.CompilerParams(
            dimension_semantics=("parallel", "arbitrary")),
    )(xp, w.astype(jnp.bfloat16), b.reshape(1, n).astype(jnp.float32), rp,
      gamma.reshape(1, n).astype(jnp.float32),
      beta.reshape(1, n).astype(jnp.float32))
    return out[:m] if mp != m else out


# ---------------------------------------------------------------------------
# fused QKV projection + wide causal self-attention
# ---------------------------------------------------------------------------

def _wide_mha(q, k, v, hp, hd, scale):
    """q/k/v: (T, hp*hd) bf16.  Returns concatenated per-head outputs (T, hp*hd) f32."""
    t = q.shape[0]
    row = jax.lax.broadcasted_iota(jnp.int32, (t, t), 0)
    col = jax.lax.broadcasted_iota(jnp.int32, (t, t), 1)
    causal = col > row
    neg = jnp.float32(-1e30)          # finite (robust vs. fully-masked rows)
    # TODO(synk): for long sequences, replace the full (T, T) score matrix with a
    # flash-style online-softmax over KV tiles to bound VMEM at O(T * tile).
    outs = []
    for h in range(hp):               # static unroll over packed heads
        qs = q[:, h * hd:(h + 1) * hd]
        ks = k[:, h * hd:(h + 1) * hd]
        vs = v[:, h * hd:(h + 1) * hd]
        s = jnp.dot(qs, ks.T, preferred_element_type=jnp.float32) * scale
        s = jnp.where(causal, neg, s)                      # causal mask
        m = jnp.max(s, axis=-1, keepdims=True)
        p = jnp.exp(s - m)
        p = p * pl.reciprocal(jnp.sum(p, axis=-1, keepdims=True), approx=True)
        outs.append(jnp.dot(p.astype(vs.dtype), vs,
                            preferred_element_type=jnp.float32))
    return outs[0] if len(outs) == 1 else jnp.concatenate(outs, axis=-1)


def _attn_fused_kernel(x_ref, wq_ref, wk_ref, wv_ref, o_ref, *, hp, hd, scale):
    """Grouped mode: project this head-group's Q/K/V in-kernel, then attend."""
    xx = x_ref[0]                                      # (T, E) bf16
    q = jnp.dot(xx, wq_ref[...], preferred_element_type=jnp.float32).astype(jnp.bfloat16)
    k = jnp.dot(xx, wk_ref[...], preferred_element_type=jnp.float32).astype(jnp.bfloat16)
    v = jnp.dot(xx, wv_ref[...], preferred_element_type=jnp.float32).astype(jnp.bfloat16)
    o = _wide_mha(q, k, v, hp, hd, scale)
    o_ref[0, :, :] = o.astype(o_ref.dtype)             # single lane-dense store


def _attn_fused_full_kernel(x_ref, w_ref, o_ref, *, heads, hd, scale):
    """Fallback mode: whole QKV projection for one batch element in-kernel."""
    xx = x_ref[0]                                      # (T, E) bf16
    qkv = jnp.dot(xx, w_ref[...], preferred_element_type=jnp.float32).astype(jnp.bfloat16)
    he = heads * hd
    o = _wide_mha(qkv[:, :he], qkv[:, he:2 * he], qkv[:, 2 * he:], heads, hd, scale)
    o_ref[0, :, :] = o.astype(o_ref.dtype)


def attention_fused_pallas(x, w_qkv, *, heads, head_dim, out_dtype=jnp.bfloat16):
    """softmax(mask(QK^T))V with the QKV projection fused in.

    x: (B, T, E) bf16; w_qkv: (E, 3*heads*head_dim) laid out as [Q | K | V].
    Returns (B, T, heads*head_dim).
    """
    b, t, e = x.shape
    scale = 1.0 / (head_dim ** 0.5)    # == (e**-0.25 on q) * (e**-0.25 on k)
    xb = x.astype(jnp.bfloat16)
    wb = w_qkv.astype(jnp.bfloat16)

    hp = _pick_heads_per_group(heads, head_dim)
    if hp is None:
        # TODO(synk): fallback keeps the full (E, 3*heads*E) weight resident; fine
        # for moderate emb, would need K-tiling for very large models.
        return pl.pallas_call(
            functools.partial(_attn_fused_full_kernel, heads=heads, hd=head_dim,
                              scale=scale),
            out_shape=jax.ShapeDtypeStruct((b, t, heads * head_dim), out_dtype),
            grid=(b,),
            in_specs=[
                pl.BlockSpec((1, t, e), lambda bi: (bi, 0, 0)),
                pl.BlockSpec((e, 3 * heads * head_dim), lambda bi: (0, 0)),
            ],
            out_specs=pl.BlockSpec((1, t, heads * head_dim), lambda bi: (bi, 0, 0)),
            compiler_params=pltpu.CompilerParams(dimension_semantics=("parallel",)),
        )(xb, wb)

    g = heads // hp
    blk_c = hp * head_dim
    # Grid ordered (group, batch): weight-slice block indices depend only on the
    # outer axis, so each slice is DMA'd once and reused across the whole batch.
    return pl.pallas_call(
        functools.partial(_attn_fused_kernel, hp=hp, hd=head_dim, scale=scale),
        out_shape=jax.ShapeDtypeStruct((b, t, heads * head_dim), out_dtype),
        grid=(g, b),
        in_specs=[
            pl.BlockSpec((1, t, e), lambda gi, bi: (bi, 0, 0)),
            pl.BlockSpec((e, blk_c), lambda gi, bi: (0, gi)),          # Q slice
            pl.BlockSpec((e, blk_c), lambda gi, bi: (0, g + gi)),      # K slice
            pl.BlockSpec((e, blk_c), lambda gi, bi: (0, 2 * g + gi)),  # V slice
        ],
        out_specs=pl.BlockSpec((1, t, blk_c), lambda gi, bi: (bi, 0, gi)),
        compiler_params=pltpu.CompilerParams(
            dimension_semantics=("parallel", "parallel")),
    )(xb, wb, wb, wb)


# ---------------------------------------------------------------------------
# fused FFN: x @ w1 + b1 -> ReLU -> @ w2 + b2 -> + x (residual) -> LayerNorm
# ---------------------------------------------------------------------------

def _ffn_ln_kernel(x_ref, w1_ref, b1_ref, w2_ref, b2_ref, g_ref, bt_ref, o_ref,
                   *, eps):
    x = x_ref[...]                                          # (tm, E) bf16
    h = jnp.dot(x, w1_ref[...], preferred_element_type=jnp.float32) + b1_ref[...]
    h = jnp.maximum(h, 0.0).astype(jnp.bfloat16)            # (tm, FF)
    y = jnp.dot(h, w2_ref[...], preferred_element_type=jnp.float32) + b2_ref[...]
    y = y + x.astype(jnp.float32)                           # residual
    mu = jnp.mean(y, axis=-1, keepdims=True)
    d = y - mu
    var = jnp.mean(d * d, axis=-1, keepdims=True)
    yn = d * jax.lax.rsqrt(var + eps)
    o_ref[...] = (yn * g_ref[...] + bt_ref[...]).astype(o_ref.dtype)


def ffn_ln_pallas(x, w1, b1, w2, b2, gamma, beta, eps=1e-5,
                  out_dtype=jnp.bfloat16, target_tm=256):
    """LayerNorm(relu(x @ w1 + b1) @ w2 + b2 + x), fully fused: the (M, FF) hidden
    never leaves VMEM and both weights are fetched exactly once."""
    m, e = x.shape
    ff = w1.shape[1]
    w_bytes = 2 * (e * ff + ff * e)
    if w_bytes > 16 * 1024 * 1024:
        # Weights too big to keep resident: fall back to the K/N-tiled two-kernel path.
        h = matmul_pallas(x, w1, b1, activation="relu")
        return matmul_add_ln_pallas(h, w2, b2, x, gamma, beta, eps=eps,
                                    out_dtype=out_dtype)

    mp, tm = _row_tiling(m, target_tm)
    xp = _pad_rows(x.astype(jnp.bfloat16), mp)

    out = pl.pallas_call(
        functools.partial(_ffn_ln_kernel, eps=eps),
        out_shape=jax.ShapeDtypeStruct((mp, e), out_dtype),
        grid=(mp // tm,),
        in_specs=[
            pl.BlockSpec((tm, e), lambda i: (i, 0)),
            pl.BlockSpec((e, ff), lambda i: (0, 0)),
            pl.BlockSpec((1, ff), lambda i: (0, 0)),
            pl.BlockSpec((ff, e), lambda i: (0, 0)),
            pl.BlockSpec((1, e), lambda i: (0, 0)),
            pl.BlockSpec((1, e), lambda i: (0, 0)),
            pl.BlockSpec((1, e), lambda i: (0, 0)),
        ],
        out_specs=pl.BlockSpec((tm, e), lambda i: (i, 0)),
        compiler_params=pltpu.CompilerParams(dimension_semantics=("parallel",)),
    )(xp, w1.astype(jnp.bfloat16), b1.reshape(1, ff).astype(jnp.float32),
      w2.astype(jnp.bfloat16), b2.reshape(1, e).astype(jnp.float32),
      gamma.reshape(1, e).astype(jnp.float32),
      beta.reshape(1, e).astype(jnp.float32))
    return out[:m] if mp != m else out


# ---------------------------------------------------------------------------
# fused final projection + log-softmax
# ---------------------------------------------------------------------------

def _linear_logsoftmax_kernel(x_ref, w_ref, b_ref, o_ref):
    logits = jnp.dot(x_ref[...], w_ref[...],
                     preferred_element_type=jnp.float32) + b_ref[...]
    m = jnp.max(logits, axis=-1, keepdims=True)
    z = logits - m
    lse = jnp.log(jnp.sum(jnp.exp(z), axis=-1, keepdims=True))
    o_ref[...] = (z - lse).astype(o_ref.dtype)


def linear_logsoftmax_pallas(x, w, b, target_tm=256):
    """log_softmax(x @ w + b, axis=-1) fused in one kernel."""
    m, k_dim = x.shape
    n = w.shape[1]
    mp, tm = _row_tiling(m, target_tm)
    xp = _pad_rows(x.astype(jnp.bfloat16), mp)
    # TODO(synk): for very large vocab, tile the vocab axis with a two-pass
    # (online max / LSE) reduction instead of one (tm, V) block.
    out = pl.pallas_call(
        _linear_logsoftmax_kernel,
        out_shape=jax.ShapeDtypeStruct((mp, n), jnp.float32),
        grid=(mp // tm,),
        in_specs=[
            pl.BlockSpec((tm, k_dim), lambda i: (i, 0)),
            pl.BlockSpec((k_dim, n), lambda i: (0, 0)),
            pl.BlockSpec((1, n), lambda i: (0, 0)),
        ],
        out_specs=pl.BlockSpec((tm, n), lambda i: (i, 0)),
        compiler_params=pltpu.CompilerParams(dimension_semantics=("parallel",)),
    )(xp, w.astype(jnp.bfloat16), b.reshape(1, n).astype(jnp.float32))
    return out[:m] if mp != m else out


# ---------------------------------------------------------------------------
# Model: parameters + forward
# ---------------------------------------------------------------------------

def init_params(key, *, emb, heads, depth, seq_length, num_tokens, scale=0.02):
    ks = iter(jax.random.split(key, 4 + depth * 4))
    p = {
        "token_emb": scale * jax.random.normal(next(ks), (num_tokens, emb), jnp.float32),
        "pos_emb": scale * jax.random.normal(next(ks), (seq_length, emb), jnp.float32),
        "w_probs": scale * jax.random.normal(next(ks), (emb, num_tokens), jnp.float32),
        "b_probs": jnp.zeros((num_tokens,), jnp.float32),
        "blocks": [],
    }
    ff = 4 * emb
    for _ in range(depth):
        blk = {
            # fused wide self-attention projection: emb -> 3*emb*heads ([Q|K|V], no bias)
            "w_qkv": scale * jax.random.normal(next(ks), (emb, 3 * emb * heads), jnp.float32),
            "wu": scale * jax.random.normal(next(ks), (emb * heads, emb), jnp.float32),
            "bu": jnp.zeros((emb,), jnp.float32),
            "g1": jnp.ones((emb,), jnp.float32),
            "be1": jnp.zeros((emb,), jnp.float32),
            "w1": scale * jax.random.normal(next(ks), (emb, ff), jnp.float32),
            "bf1": jnp.zeros((ff,), jnp.float32),
            "w2": scale * jax.random.normal(next(ks), (ff, emb), jnp.float32),
            "bf2": jnp.zeros((emb,), jnp.float32),
            "g2": jnp.ones((emb,), jnp.float32),
            "be2": jnp.zeros((emb,), jnp.float32),
        }
        p["blocks"].append(blk)
    return p


def transformer_block(x, blk, *, heads):
    # x: (b, t, e) bf16
    b, t, e = x.shape
    xf = x.reshape(b * t, e)

    # fused QKV projection + causal wide attention (QKV buffer never hits HBM)
    attn = attention_fused_pallas(x, blk["w_qkv"], heads=heads, head_dim=e)
    attn = attn.reshape(b * t, heads * e)

    # fused: output projection + residual + LayerNorm
    x1 = matmul_add_ln_pallas(attn, blk["wu"], blk["bu"], xf, blk["g1"], blk["be1"])

    # fused FFN: emb -> 4*emb (ReLU) -> emb, + residual + LayerNorm, one kernel
    x2 = ffn_ln_pallas(x1, blk["w1"], blk["bf1"], blk["w2"], blk["bf2"],
                       blk["g2"], blk["be2"])
    return x2.reshape(b, t, e)


def gtransformer_forward(tokens, params, *, heads):
    # tokens: (b, t) int32 ids.  Embedding gathers stay in plain JAX/XLA.
    b, t = tokens.shape
    tok = params["token_emb"][tokens]                      # (b, t, e)
    pos = params["pos_emb"][:t][None, :, :]                # (1, t, e)
    x = (tok + pos).astype(jnp.bfloat16)

    for blk in params["blocks"]:
        x = transformer_block(x, blk, heads=heads)

    e = x.shape[-1]
    logp = linear_logsoftmax_pallas(x.reshape(b * t, e),
                                    params["w_probs"], params["b_probs"])
    num_tokens = params["w_probs"].shape[1]
    return logp.reshape(b, t, num_tokens)


# ---------------------------------------------------------------------------

if __name__ == "__main__":
    emb, heads, depth, seq_length, num_tokens = 32, 4, 2, 8, 128
    batch = 2

    key = jax.random.PRNGKey(0)
    k_params, k_tokens = jax.random.split(key)
    params = init_params(k_params, emb=emb, heads=heads, depth=depth,
                         seq_length=seq_length, num_tokens=num_tokens)
    tokens = jax.random.randint(k_tokens, (batch, seq_length), 0, num_tokens,
                                dtype=jnp.int32)

    fwd = jax.jit(functools.partial(gtransformer_forward, heads=heads))
    out = fwd(tokens, params)
    out = jax.block_until_ready(out)

    assert out.shape == (batch, seq_length, num_tokens), out.shape
    # rows of log-probabilities must (log-)sum to ~1
    assert bool(jnp.allclose(jnp.exp(out).sum(-1), 1.0, atol=1e-4))
    print("KERNEL_OK")
</pallas_src>

<mosaic_0001>
module attributes {stable_mosaic.version = 11 : i64} {
  func.func @_attn_fused_kernel(%arg0: i32, %arg1: i32, %arg2: memref<1x8x32xbf16, #tpu.memory_space<vmem>>, %arg3: memref<32x128xbf16, #tpu.memory_space<vmem>>, %arg4: memref<32x128xbf16, #tpu.memory_space<vmem>>, %arg5: memref<32x128xbf16, #tpu.memory_space<vmem>>, %arg6: memref<1x8x128xbf16, #tpu.memory_space<vmem>>) attributes {dimension_semantics = [#tpu.dimension_semantics<parallel>, #tpu.dimension_semantics<parallel>], iteration_bounds = array<i64: 1, 2>, scalar_prefetch = 0 : i64, scratch_operands = 0 : i64, tpu.core_type = #tpu.core_type<tc>, window_params = [{transform_indices = @transform_0, window_bounds = array<i64: 1, 8, 32>}, {transform_indices = @transform_1, window_bounds = array<i64: 32, 128>}, {transform_indices = @transform_2, window_bounds = array<i64: 32, 128>}, {transform_indices = @transform_3, window_bounds = array<i64: 32, 128>}, {transform_indices = @transform_4, window_bounds = array<i64: 1, 8, 128>}]} {
    %c0 = arith.constant 0 : index
    %c0_0 = arith.constant 0 : index
    %c0_1 = arith.constant 0 : index
    %0 = vector.load %arg2[%c0, %c0_0, %c0_1] : memref<1x8x32xbf16, #tpu.memory_space<vmem>>, vector<1x8x32xbf16>
    %1 = vector.shape_cast %0 : vector<1x8x32xbf16> to vector<8x32xbf16>
    %c0_2 = arith.constant 0 : index
    %c0_3 = arith.constant 0 : index
    %2 = vector.load %arg3[%c0_2, %c0_3] : memref<32x128xbf16, #tpu.memory_space<vmem>>, vector<32x128xbf16>
    %cst = arith.constant dense<0.000000e+00> : vector<8x128xf32>
    %3 = tpu.matmul %1, %2, %cst {dimension_numbers = #tpu.dot_dimension_numbers<[1], [0], [0], [1], [0, 0, 1, 1], [], []>} : vector<8x32xbf16>, vector<32x128xbf16>, vector<8x128xf32> -> vector<8x128xf32>
    %4 = arith.truncf %3 : vector<8x128xf32> to vector<8x128xbf16>
    %c0_4 = arith.constant 0 : index
    %c0_5 = arith.constant 0 : index
    %5 = vector.load %arg4[%c0_4, %c0_5] : memref<32x128xbf16, #tpu.memory_space<vmem>>, vector<32x128xbf16>
    %cst_6 = arith.constant dense<0.000000e+00> : vector<8x128xf32>
    %6 = tpu.matmul %1, %5, %cst_6 {dimension_numbers = #tpu.dot_dimension_numbers<[1], [0], [0], [1], [0, 0, 1, 1], [], []>} : vector<8x32xbf16>, vector<32x128xbf16>, vector<8x128xf32> -> vector<8x128xf32>
    %7 = arith.truncf %6 : vector<8x128xf32> to vector<8x128xbf16>
    %c0_7 = arith.constant 0 : index
    %c0_8 = arith.constant 0 : index
    %8 = vector.load %arg5[%c0_7, %c0_8] : memref<32x128xbf16, #tpu.memory_space<vmem>>, vector<32x128xbf16>
    %cst_9 = arith.constant dense<0.000000e+00> : vector<8x128xf32>
    %9 = tpu.matmul %1, %8, %cst_9 {dimension_numbers = #tpu.dot_dimension_numbers<[1], [0], [0], [1], [0, 0, 1, 1], [], []>} : vector<8x32xbf16>, vector<32x128xbf16>, vector<8x128xf32> -> vector<8x128xf32>
    %10 = arith.truncf %9 : vector<8x128xf32> to vector<8x128xbf16>
    %11 = tpu.iota {dimensions = array<i32: 0>} : vector<8x8xi32>
    %12 = tpu.iota {dimensions = array<i32: 1>} : vector<8x8xi32>
    %13 = arith.cmpi sgt, %12, %11 : vector<8x8xi32>
    %14 = vector.extract_strided_slice %4 {offsets = [0, 0], sizes = [8, 32], strides = [1, 1]} : vector<8x128xbf16> to vector<8x32xbf16>
    %15 = vector.extract_strided_slice %7 {offsets = [0, 0], sizes = [8, 32], strides = [1, 1]} : vector<8x128xbf16> to vector<8x32xbf16>
    %16 = vector.extract_strided_slice %10 {offsets = [0, 0], sizes = [8, 32], strides = [1, 1]} : vector<8x128xbf16> to vector<8x32xbf16>
    %17 = tpu.transpose %15, [1, 0] : vector<8x32xbf16> -> vector<32x8xbf16>
    %cst_10 = arith.constant dense<0.000000e+00> : vector<8x8xf32>
    %18 = tpu.matmul %14, %17, %cst_10 {dimension_numbers = #tpu.dot_dimension_numbers<[1], [0], [0], [1], [0, 0, 1, 1], [], []>} : vector<8x32xbf16>, vector<32x8xbf16>, vector<8x8xf32> -> vector<8x8xf32>
    %cst_11 = arith.constant 0.176776692 : f32
    %19 = vector.broadcast %cst_11 : f32 to vector<8x8xf32>
    %20 = arith.mulf %18, %19 : vector<8x8xf32>
    %cst_12 = arith.constant -1.000000e+30 : f32
    %21 = vector.broadcast %cst_12 : f32 to vector<8x8xf32>
    %22 = arith.select %13, %21, %20 : vector<8x8xi1>, vector<8x8xf32>
    %cst_13 = arith.constant dense<0xFF800000> : vector<8xf32>
    %23 = vector.multi_reduction <maximumf>, %22, %cst_13 [1] : vector<8x8xf32> to vector<8xf32>
    %24 = vector.shape_cast %23 : vector<8xf32> to vector<8x1xf32>
    %25 = vector.broadcast %24 : vector<8x1xf32> to vector<8x8xf32>
    %26 = arith.subf %22, %25 : vector<8x8xf32>
    %27 = math.exp %26 : vector<8x8xf32>
    %cst_14 = arith.constant dense<0.000000e+00> : vector<8xf32>
    %28 = vector.multi_reduction <add>, %27, %cst_14 [1] : vector<8x8xf32> to vector<8xf32>
    %29 = vector.shape_cast %28 : vector<8xf32> to vector<8x1xf32>
    %30 = tpu.reciprocal %29 {approx = true} : vector<8x1xf32> -> vector<8x1xf32>
    %31 = vector.broadcast %30 : vector<8x1xf32> to vector<8x8xf32>
    %32 = arith.mulf %27, %31 : vector<8x8xf32>
    %33 = arith.truncf %32 : vector<8x8xf32> to vector<8x8xbf16>
    %cst_15 = arith.constant dense<0.000000e+00> : vector<8x32xf32>
    %34 = tpu.matmul %33, %16, %cst_15 {dimension_numbers = #tpu.dot_dimension_numbers<[1], [0], [0], [1], [0, 0, 1, 1], [], []>} : vector<8x8xbf16>, vector<8x32xbf16>, vector<8x32xf32> -> vector<8x32xf32>
    %35 = vector.extract_strided_slice %4 {offsets = [0, 32], sizes = [8, 32], strides = [1, 1]} : vector<8x128xbf16> to vector<8x32xbf16>
    %36 = vector.extract_strided_slice %7 {offsets = [0, 32], sizes = [8, 32], strides = [1, 1]} : vector<8x128xbf16> to vector<8x32xbf16>
    %37 = vector.extract_strided_slice %10 {offsets = [0, 32], sizes = [8, 32], strides = [1, 1]} : vector<8x128xbf16> to vector<8x32xbf16>
    %38 = tpu.transpose %36, [1, 0] : vector<8x32xbf16> -> vector<32x8xbf16>
    %cst_16 = arith.constant dense<0.000000e+00> : vector<8x8xf32>
    %39 = tpu.matmul %35, %38, %cst_16 {dimension_numbers = #tpu.dot_dimension_numbers<[1], [0], [0], [1], [0, 0, 1, 1], [], []>} : vector<8x32xbf16>, vector<32x8xbf16>, vector<8x8xf32> -> vector<8x8xf32>
    %cst_17 = arith.constant 0.176776692 : f32
    %40 = vector.broadcast %cst_17 : f32 to vector<8x8xf32>
    %41 = arith.mulf %39, %40 : vector<8x8xf32>
    %cst_18 = arith.constant -1.000000e+30 : f32
    %42 = vector.broadcast %cst_18 : f32 to vector<8x8xf32>
    %43 = arith.select %13, %42, %41 : vector<8x8xi1>, vector<8x8xf32>
    %cst_19 = arith.constant dense<0xFF800000> : vector<8xf32>
    %44 = vector.multi_reduction <maximumf>, %43, %cst_19 [1] : vector<8x8xf32> to vector<8xf32>
    %45 = vector.shape_cast %44 : vector<8xf32> to vector<8x1xf32>
    %46 = vector.broadcast %45 : vector<8x1xf32> to vector<8x8xf32>
    %47 = arith.subf %43, %46 : vector<8x8xf32>
    %48 = math.exp %47 : vector<8x8xf32>
    %cst_20 = arith.constant dense<0.000000e+00> : vector<8xf32>
    %49 = vector.multi_reduction <add>, %48, %cst_20 [1] : vector<8x8xf32> to vector<8xf32>
    %50 = vector.shape_cast %49 : vector<8xf32> to vector<8x1xf32>
    %51 = tpu.reciprocal %50 {approx = true} : vector<8x1xf32> -> vector<8x1xf32>
    %52 = vector.broadcast %51 : vector<8x1xf32> to vector<8x8xf32>
    %53 = arith.mulf %48, %52 : vector<8x8xf32>
    %54 = arith.truncf %53 : vector<8x8xf32> to vector<8x8xbf16>
    %cst_21 = arith.constant dense<0.000000e+00> : vector<8x32xf32>
    %55 = tpu.matmul %54, %37, %cst_21 {dimension_numbers = #tpu.dot_dimension_numbers<[1], [0], [0], [1], [0, 0, 1, 1], [], []>} : vector<8x8xbf16>, vector<8x32xbf16>, vector<8x32xf32> -> vector<8x32xf32>
    %56 = vector.extract_strided_slice %4 {offsets = [0, 64], sizes = [8, 32], strides = [1, 1]} : vector<8x128xbf16> to vector<8x32xbf16>
    %57 = vector.extract_strided_slice %7 {offsets = [0, 64], sizes = [8, 32], strides = [1, 1]} : vector<8x128xbf16> to vector<8x32xbf16>
    %58 = vector.extract_strided_slice %10 {offsets = [0, 64], sizes = [8, 32], strides = [1, 1]} : vector<8x128xbf16> to vector<8x32xbf16>
    %59 = tpu.transpose %57, [1, 0] : vector<8x32xbf16> -> vector<32x8xbf16>
    %cst_22 = arith.constant dense<0.000000e+00> : vector<8x8xf32>
    %60 = tpu.matmul %56, %59, %cst_22 {dimension_numbers = #tpu.dot_dimension_numbers<[1], [0], [0], [1], [0, 0, 1, 1], [], []>} : vector<8x32xbf16>, vector<32x8xbf16>, vector<8x8xf32> -> vector<8x8xf32>
    %cst_23 = arith.constant 0.176776692 : f32
    %61 = vector.broadcast %cst_23 : f32 to vector<8x8xf32>
    %62 = arith.mulf %60, %61 : vector<8x8xf32>
    %cst_24 = arith.constant -1.000000e+30 : f32
    %63 = vector.broadcast %cst_24 : f32 to vector<8x8xf32>
    %64 = arith.select %13, %63, %62 : vector<8x8xi1>, vector<8x8xf32>
    %cst_25 = arith.constant dense<0xFF800000> : vector<8xf32>
    %65 = vector.multi_reduction <maximumf>, %64, %cst_25 [1] : vector<8x8xf32> to vector<8xf32>
    %66 = vector.shape_cast %65 : vector<8xf32> to vector<8x1xf32>
    %67 = vector.broadcast %66 : vector<8x1xf32> to vector<8x8xf32>
    %68 = arith.subf %64, %67 : vector<8x8xf32>
    %69 = math.exp %68 : vector<8x8xf32>
    %cst_26 = arith.constant dense<0.000000e+00> : vector<8xf32>
    %70 = vector.multi_reduction <add>, %69, %cst_26 [1] : vector<8x8xf32> to vector<8xf32>
    %71 = vector.shape_cast %70 : vector<8xf32> to vector<8x1xf32>
    %72 = tpu.reciprocal %71 {approx = true} : vector<8x1xf32> -> vector<8x1xf32>
    %73 = vector.broadcast %72 : vector<8x1xf32> to vector<8x8xf32>
    %74 = arith.mulf %69, %73 : vector<8x8xf32>
    %75 = arith.truncf %74 : vector<8x8xf32> to vector<8x8xbf16>
    %cst_27 = arith.constant dense<0.000000e+00> : vector<8x32xf32>
    %76 = tpu.matmul %75, %58, %cst_27 {dimension_numbers = #tpu.dot_dimension_numbers<[1], [0], [0], [1], [0, 0, 1, 1], [], []>} : vector<8x8xbf16>, vector<8x32xbf16>, vector<8x32xf32> -> vector<8x32xf32>
    %77 = vector.extract_strided_slice %4 {offsets = [0, 96], sizes = [8, 32], strides = [1, 1]} : vector<8x128xbf16> to vector<8x32xbf16>
    %78 = vector.extract_strided_slice %7 {offsets = [0, 96], sizes = [8, 32], strides = [1, 1]} : vector<8x128xbf16> to vector<8x32xbf16>
    %79 = vector.extract_strided_slice %10 {offsets = [0, 96], sizes = [8, 32], strides = [1, 1]} : vector<8x128xbf16> to vector<8x32xbf16>
    %80 = tpu.transpose %78, [1, 0] : vector<8x32xbf16> -> vector<32x8xbf16>
    %cst_28 = arith.constant dense<0.000000e+00> : vector<8x8xf32>
    %81 = tpu.matmul %77, %80, %cst_28 {dimension_numbers = #tpu.dot_dimension_numbers<[1], [0], [0], [1], [0, 0, 1, 1], [], []>} : vector<8x32xbf16>, vector<32x8xbf16>, vector<8x8xf32> -> vector<8x8xf32>
    %cst_29 = arith.constant 0.176776692 : f32
    %82 = vector.broadcast %cst_29 : f32 to vector<8x8xf32>
    %83 = arith.mulf %81, %82 : vector<8x8xf32>
    %cst_30 = arith.constant -1.000000e+30 : f32
    %84 = vector.broadcast %cst_30 : f32 to vector<8x8xf32>
    %85 = arith.select %13, %84, %83 : vector<8x8xi1>, vector<8x8xf32>
    %cst_31 = arith.constant dense<0xFF800000> : vector<8xf32>
    %86 = vector.multi_reduction <maximumf>, %85, %cst_31 [1] : vector<8x8xf32> to vector<8xf32>
    %87 = vector.shape_cast %86 : vector<8xf32> to vector<8x1xf32>
    %88 = vector.broadcast %87 : vector<8x1xf32> to vector<8x8xf32>
    %89 = arith.subf %85, %88 : vector<8x8xf32>
    %90 = math.exp %89 : vector<8x8xf32>
    %cst_32 = arith.constant dense<0.000000e+00> : vector<8xf32>
    %91 = vector.multi_reduction <add>, %90, %cst_32 [1] : vector<8x8xf32> to vector<8xf32>
    %92 = vector.shape_cast %91 : vector<8xf32> to vector<8x1xf32>
    %93 = tpu.reciprocal %92 {approx = true} : vector<8x1xf32> -> vector<8x1xf32>
    %94 = vector.broadcast %93 : vector<8x1xf32> to vector<8x8xf32>
    %95 = arith.mulf %90, %94 : vector<8x8xf32>
    %96 = arith.truncf %95 : vector<8x8xf32> to vector<8x8xbf16>
    %cst_33 = arith.constant dense<0.000000e+00> : vector<8x32xf32>
    %97 = tpu.matmul %96, %79, %cst_33 {dimension_numbers = #tpu.dot_dimension_numbers<[1], [0], [0], [1], [0, 0, 1, 1], [], []>} : vector<8x8xbf16>, vector<8x32xbf16>, vector<8x32xf32> -> vector<8x32xf32>
    %98 = tpu.concatenate %34, %55, %76, %97 in 1 : vector<8x32xf32>, vector<8x32xf32>, vector<8x32xf32>, vector<8x32xf32> -> vector<8x128xf32>
    %99 = arith.truncf %98 : vector<8x128xf32> to vector<8x128xbf16>
    %c0_34 = arith.constant 0 : index
    %c0_35 = arith.constant 0 : index
    %c0_36 = arith.constant 0 : index
    %100 = vector.load %arg6[%c0_34, %c0_35, %c0_36] : memref<1x8x128xbf16, #tpu.memory_space<vmem>>, vector<1x8x128xbf16>
    %101 = vector.shape_cast %100 : vector<1x8x128xbf16> to vector<8x128xbf16>
    %102 = vector.shape_cast %99 : vector<8x128xbf16> to vector<1x8x128xbf16>
    tpu.vector_store %arg6[%c0_34, %c0_35, %c0_36], %102 {strides = array<i32>} : memref<1x8x128xbf16, #tpu.memory_space<vmem>>, vector<1x8x128xbf16>,
    return
  }
  func.func @transform_0(%arg0: i32, %arg1: i32) -> (i32, i32, i32) {
    %c0_i32 = arith.constant 0 : i32
    %c0_i32_0 = arith.constant 0 : i32
    %c0_i32_1 = arith.constant 0 : i32
    return %arg1, %c0_i32, %c0_i32_0 : i32, i32, i32
  }
  func.func @transform_1(%arg0: i32, %arg1: i32) -> (i32, i32) {
    %c0_i32 = arith.constant 0 : i32
    %c0_i32_0 = arith.constant 0 : i32
    return %c0_i32, %arg0 : i32, i32
  }
  func.func @transform_2(%arg0: i32, %arg1: i32) -> (i32, i32) {
    %c1_i32 = arith.constant 1 : i32
    %0 = arith.addi %c1_i32, %arg0 : i32
    %c0_i32 = arith.constant 0 : i32
    %c0_i32_0 = arith.constant 0 : i32
    return %c0_i32, %0 : i32, i32
  }
  func.func @transform_3(%arg0: i32, %arg1: i32) -> (i32, i32) {
    %c2_i32 = arith.constant 2 : i32
    %0 = arith.addi %c2_i32, %arg0 : i32
    %c0_i32 = arith.constant 0 : i32
    %c0_i32_0 = arith.constant 0 : i32
    return %c0_i32, %0 : i32, i32
  }
  func.func @transform_4(%arg0: i32, %arg1: i32) -> (i32, i32, i32) {
    %c0_i32 = arith.constant 0 : i32
    %c0_i32_0 = arith.constant 0 : i32
    return %arg1, %c0_i32, %arg0 : i32, i32, i32
  }
}

module attributes {stable_mosaic.version = 11 : i64} {
  func.func @_matmul_res_ln_kernel(%arg0: i32, %arg1: i32, %arg2: memref<16x128xbf16, #tpu.memory_space<vmem>>, %arg3: memref<128x32xbf16, #tpu.memory_space<vmem>>, %arg4: memref<1x32xf32, #tpu.memory_space<vmem>>, %arg5: memref<16x32xbf16, #tpu.memory_space<vmem>>, %arg6: memref<1x32xf32, #tpu.memory_space<vmem>>, %arg7: memref<1x32xf32, #tpu.memory_space<vmem>>, %arg8: memref<16x32xbf16, #tpu.memory_space<vmem>>, %arg9: memref<16x32xf32, #tpu.memory_space<vmem>>) attributes {dimension_semantics = [#tpu.dimension_semantics<parallel>, #tpu.dimension_semantics<arbitrary>], iteration_bounds = array<i64: 1, 1>, scalar_prefetch = 0 : i64, scratch_operands = 1 : i64, tpu.core_type = #tpu.core_type<tc>, window_params = [{transform_indices = @transform_0, window_bounds = array<i64: 16, 128>}, {transform_indices = @transform_1, window_bounds = array<i64: 128, 32>}, {pipeline_mode = #tpu.pipeline_mode<synchronous>, transform_indices = @transform_2, window_bounds = array<i64: 1, 32>}, {transform_indices = @transform_3, window_bounds = array<i64: 16, 32>}, {pipeline_mode = #tpu.pipeline_mode<synchronous>, transform_indices = @transform_4, window_bounds = array<i64: 1, 32>}, {pipeline_mode = #tpu.pipeline_mode<synchronous>, transform_indices = @transform_5, window_bounds = array<i64: 1, 32>}, {transform_indices = @transform_6, window_bounds = array<i64: 16, 32>}]} {
    %c0_i32 = arith.constant 0 : i32
    %0 = arith.cmpi eq, %arg1, %c0_i32 : i32
    %1 = arith.extui %0 : i1 to i32
    %c0_i32_0 = arith.constant 0 : i32
    %2 = arith.cmpi ne, %1, %c0_i32_0 : i32
    scf.if %2 {
      %cst_10 = arith.constant 0.000000e+00 : f32
      %12 = vector.broadcast %cst_10 : f32 to vector<16x32xf32>
      %c0_11 = arith.constant 0 : index
      %c0_12 = arith.constant 0 : index
      %13 = vector.load %arg9[%c0_11, %c0_12] : memref<16x32xf32, #tpu.memory_space<vmem>>, vector<16x32xf32>
      tpu.vector_store %arg9[%c0_11, %c0_12], %12 {strides = array<i32>} : memref<16x32xf32, #tpu.memory_space<vmem>>, vector<16x32xf32>,
    } else {
    }
    %c0 = arith.constant 0 : index
    %c0_1 = arith.constant 0 : index
    %3 = vector.load %arg9[%c0, %c0_1] : memref<16x32xf32, #tpu.memory_space<vmem>>, vector<16x32xf32>
    %c0_2 = arith.constant 0 : index
    %c0_3 = arith.constant 0 : index
    %4 = vector.load %arg2[%c0_2, %c0_3] : memref<16x128xbf16, #tpu.memory_space<vmem>>, vector<16x128xbf16>
    %c0_4 = arith.constant 0 : index
    %c0_5 = arith.constant 0 : index
    %5 = vector.load %arg3[%c0_4, %c0_5] : memref<128x32xbf16, #tpu.memory_space<vmem>>, vector<128x32xbf16>
    %cst = arith.constant dense<0.000000e+00> : vector<16x32xf32>
    %6 = tpu.matmul %4, %5, %cst {dimension_numbers = #tpu.dot_dimension_numbers<[1], [0], [0], [1], [0, 0, 1, 1], [], []>} : vector<16x128xbf16>, vector<128x32xbf16>, vector<16x32xf32> -> vector<16x32xf32>
    %7 = arith.addf %3, %6 : vector<16x32xf32>
    %c0_6 = arith.constant 0 : index
    %c0_7 = arith.constant 0 : index
    %8 = vector.load %arg9[%c0_6, %c0_7] : memref<16x32xf32, #tpu.memory_space<vmem>>, vector<16x32xf32>
    tpu.vector_store %arg9[%c0_6, %c0_7], %7 {strides = array<i32>} : memref<16x32xf32, #tpu.memory_space<vmem>>, vector<16x32xf32>,
    %c0_i32_8 = arith.constant 0 : i32
    %9 = arith.cmpi eq, %arg1, %c0_i32_8 : i32
    %10 = arith.extui %9 : i1 to i32
    %c0_i32_9 = arith.constant 0 : i32
    %11 = arith.cmpi ne, %10, %c0_i32_9 : i32
    scf.if %11 {
      %c0_10 = arith.constant 0 : index
      %c0_11 = arith.constant 0 : index
      %12 = vector.load %arg9[%c0_10, %c0_11] : memref<16x32xf32, #tpu.memory_space<vmem>>, vector<16x32xf32>
      %c0_12 = arith.constant 0 : index
      %c0_13 = arith.constant 0 : index
      %13 = vector.load %arg4[%c0_12, %c0_13] : memref<1x32xf32, #tpu.memory_space<vmem>>, vector<1x32xf32>
      %14 = vector.broadcast %13 : vector<1x32xf32> to vector<16x32xf32>
      %15 = arith.addf %12, %14 : vector<16x32xf32>
      %c0_14 = arith.constant 0 : index
      %c0_15 = arith.constant 0 : index
      %16 = vector.load %arg5[%c0_14, %c0_15] : memref<16x32xbf16, #tpu.memory_space<vmem>>, vector<16x32xbf16>
      %17 = arith.extf %16 : vector<16x32xbf16> to vector<16x32xf32>
      %18 = arith.addf %15, %17 : vector<16x32xf32>
      %cst_16 = arith.constant dense<0.000000e+00> : vector<16xf32>
      %19 = vector.multi_reduction <add>, %18, %cst_16 [1] : vector<16x32xf32> to vector<16xf32>
      %20 = vector.shape_cast %19 : vector<16xf32> to vector<16x1xf32>
      %cst_17 = arith.constant 3.200000e+01 : f32
      %21 = vector.broadcast %cst_17 : f32 to vector<16x1xf32>
      %22 = arith.divf %20, %21 : vector<16x1xf32>
      %23 = vector.broadcast %22 : vector<16x1xf32> to vector<16x32xf32>
      %24 = arith.subf %18, %23 : vector<16x32xf32>
      %25 = arith.mulf %24, %24 : vector<16x32xf32>
      %cst_18 = arith.constant dense<0.000000e+00> : vector<16xf32>
      %26 = vector.multi_reduction <add>, %25, %cst_18 [1] : vector<16x32xf32> to vector<16xf32>
      %27 = vector.shape_cast %26 : vector<16xf32> to vector<16x1xf32>
      %cst_19 = arith.constant 3.200000e+01 : f32
      %28 = vector.broadcast %cst_19 : f32 to vector<16x1xf32>
      %29 = arith.divf %27, %28 : vector<16x1xf32>
      %cst_20 = arith.constant 9.99999974E-6 : f32
      %30 = vector.broadcast %cst_20 : f32 to vector<16x1xf32>
      %31 = arith.addf %29, %30 : vector<16x1xf32>
      %32 = math.rsqrt %31 : vector<16x1xf32>
      %33 = vector.broadcast %32 : vector<16x1xf32> to vector<16x32xf32>
      %34 = arith.mulf %24, %33 : vector<16x32xf32>
      %c0_21 = arith.constant 0 : index
      %c0_22 = arith.constant 0 : index
      %35 = vector.load %arg6[%c0_21, %c0_22] : memref<1x32xf32, #tpu.memory_space<vmem>>, vector<1x32xf32>
      %36 = vector.broadcast %35 : vector<1x32xf32> to vector<16x32xf32>
      %37 = arith.mulf %34, %36 : vector<16x32xf32>
      %c0_23 = arith.constant 0 : index
      %c0_24 = arith.constant 0 : index
      %38 = vector.load %arg7[%c0_23, %c0_24] : memref<1x32xf32, #tpu.memory_space<vmem>>, vector<1x32xf32>
      %39 = vector.broadcast %38 : vector<1x32xf32> to vector<16x32xf32>
      %40 = arith.addf %37, %39 : vector<16x32xf32>
      %41 = arith.truncf %40 : vector<16x32xf32> to vector<16x32xbf16>
      %c0_25 = arith.constant 0 : index
      %c0_26 = arith.constant 0 : index
      %42 = vector.load %arg8[%c0_25, %c0_26] : memref<16x32xbf16, #tpu.memory_space<vmem>>, vector<16x32xbf16>
      tpu.vector_store %arg8[%c0_25, %c0_26], %41 {strides = array<i32>} : memref<16x32xbf16, #tpu.memory_space<vmem>>, vector<16x32xbf16>,
    } else {
    }
    return
  }
  func.func @transform_0(%arg0: i32, %arg1: i32) -> (i32, i32) {
    %c0_i32 = arith.constant 0 : i32
    return %arg0, %arg1 : i32, i32
  }
  func.func @transform_1(%arg0: i32, %arg1: i32) -> (i32, i32) {
    %c0_i32 = arith.constant 0 : i32
    %c0_i32_0 = arith.constant 0 : i32
    return %arg1, %c0_i32 : i32, i32
  }
  func.func @transform_2(%arg0: i32, %arg1: i32) -> (i32, i32) {
    %c0_i32 = arith.constant 0 : i32
    %c0_i32_0 = arith.constant 0 : i32
    %c0_i32_1 = arith.constant 0 : i32
    return %c0_i32, %c0_i32_0 : i32, i32
  }
  func.func @transform_3(%arg0: i32, %arg1: i32) -> (i32, i32) {
    %c0_i32 = arith.constant 0 : i32
    %c0_i32_0 = arith.constant 0 : i32
    return %arg0, %c0_i32 : i32, i32
  }
  func.func @transform_4(%arg0: i32, %arg1: i32) -> (i32, i32) {
    %c0_i32 = arith.constant 0 : i32
    %c0_i32_0 = arith.constant 0 : i32
    %c0_i32_1 = arith.constant 0 : i32
    return %c0_i32, %c0_i32_0 : i32, i32
  }
  func.func @transform_5(%arg0: i32, %arg1: i32) -> (i32, i32) {
    %c0_i32 = arith.constant 0 : i32
    %c0_i32_0 = arith.constant 0 : i32
    %c0_i32_1 = arith.constant 0 : i32
    return %c0_i32, %c0_i32_0 : i32, i32
  }
  func.func @transform_6(%arg0: i32, %arg1: i32) -> (i32, i32) {
    %c0_i32 = arith.constant 0 : i32
    %c0_i32_0 = arith.constant 0 : i32
    return %arg0, %c0_i32 : i32, i32
  }
}

module attributes {stable_mosaic.version = 11 : i64} {
  func.func @_linear_logsoftmax_kernel(%arg0: i32, %arg1: memref<16x32xbf16, #tpu.memory_space<vmem>>, %arg2: memref<32x128xbf16, #tpu.memory_space<vmem>>, %arg3: memref<1x128xf32, #tpu.memory_space<vmem>>, %arg4: memref<16x128xf32, #tpu.memory_space<vmem>>) attributes {dimension_semantics = [#tpu.dimension_semantics<parallel>], iteration_bounds = array<i64: 1>, scalar_prefetch = 0 : i64, scratch_operands = 0 : i64, tpu.core_type = #tpu.core_type<tc>, window_params = [{transform_indices = @transform_0, window_bounds = array<i64: 16, 32>}, {pipeline_mode = #tpu.pipeline_mode<synchronous>, transform_indices = @transform_1, window_bounds = array<i64: 32, 128>}, {pipeline_mode = #tpu.pipeline_mode<synchronous>, transform_indices = @transform_2, window_bounds = array<i64: 1, 128>}, {transform_indices = @transform_3, window_bounds = array<i64: 16, 128>}]} {
    %c0 = arith.constant 0 : index
    %c0_0 = arith.constant 0 : index
    %0 = vector.load %arg1[%c0, %c0_0] : memref<16x32xbf16, #tpu.memory_space<vmem>>, vector<16x32xbf16>
    %c0_1 = arith.constant 0 : index
    %c0_2 = arith.constant 0 : index
    %1 = vector.load %arg2[%c0_1, %c0_2] : memref<32x128xbf16, #tpu.memory_space<vmem>>, vector<32x128xbf16>
    %cst = arith.constant dense<0.000000e+00> : vector<16x128xf32>
    %2 = tpu.matmul %0, %1, %cst {dimension_numbers = #tpu.dot_dimension_numbers<[1], [0], [0], [1], [0, 0, 1, 1], [], []>} : vector<16x32xbf16>, vector<32x128xbf16>, vector<16x128xf32> -> vector<16x128xf32>
    %c0_3 = arith.constant 0 : index
    %c0_4 = arith.constant 0 : index
    %3 = vector.load %arg3[%c0_3, %c0_4] : memref<1x128xf32, #tpu.memory_space<vmem>>, vector<1x128xf32>
    %4 = vector.broadcast %3 : vector<1x128xf32> to vector<16x128xf32>
    %5 = arith.addf %2, %4 : vector<16x128xf32>
    %cst_5 = arith.constant dense<0xFF800000> : vector<16xf32>
    %6 = vector.multi_reduction <maximumf>, %5, %cst_5 [1] : vector<16x128xf32> to vector<16xf32>
    %7 = vector.shape_cast %6 : vector<16xf32> to vector<16x1xf32>
    %8 = vector.broadcast %7 : vector<16x1xf32> to vector<16x128xf32>
    %9 = arith.subf %5, %8 : vector<16x128xf32>
    %10 = math.exp %9 : vector<16x128xf32>
    %cst_6 = arith.constant dense<0.000000e+00> : vector<16xf32>
    %11 = vector.multi_reduction <add>, %10, %cst_6 [1] : vector<16x128xf32> to vector<16xf32>
    %12 = vector.shape_cast %11 : vector<16xf32> to vector<16x1xf32>
    %13 = math.log %12 : vector<16x1xf32>
    %14 = vector.broadcast %13 : vector<16x1xf32> to vector<16x128xf32>
    %15 = arith.subf %9, %14 : vector<16x128xf32>
    %c0_7 = arith.constant 0 : index
    %c0_8 = arith.constant 0 : index
    %16 = vector.load %arg4[%c0_7, %c0_8] : memref<16x128xf32, #tpu.memory_space<vmem>>, vector<16x128xf32>
    tpu.vector_store %arg4[%c0_7, %c0_8], %15 {strides = array<i32>} : memref<16x128xf32, #tpu.memory_space<vmem>>, vector<16x128xf32>,
    return
  }
  func.func @transform_0(%arg0: i32) -> (i32, i32) {
    %c0_i32 = arith.constant 0 : i32
    %c0_i32_0 = arith.constant 0 : i32
    return %arg0, %c0_i32 : i32, i32
  }
  func.func @transform_1(%arg0: i32) -> (i32, i32) {
    %c0_i32 = arith.constant 0 : i32
    %c0_i32_0 = arith.constant 0 : i32
    %c0_i32_1 = arith.constant 0 : i32
    return %c0_i32, %c0_i32_0 : i32, i32
  }
  func.func @transform_2(%arg0: i32) -> (i32, i32) {
    %c0_i32 = arith.constant 0 : i32
    %c0_i32_0 = arith.constant 0 : i32
    %c0_i32_1 = arith.constant 0 : i32
    return %c0_i32, %c0_i32_0 : i32, i32
  }
  func.func @transform_3(%arg0: i32) -> (i32, i32) {
    %c0_i32 = arith.constant 0 : i32
    %c0_i32_0 = arith.constant 0 : i32
    return %arg0, %c0_i32 : i32, i32
  }
}

module attributes {stable_mosaic.version = 11 : i64} {
  func.func @_ffn_ln_kernel(%arg0: i32, %arg1: memref<16x32xbf16, #tpu.memory_space<vmem>>, %arg2: memref<32x128xbf16, #tpu.memory_space<vmem>>, %arg3: memref<1x128xf32, #tpu.memory_space<vmem>>, %arg4: memref<128x32xbf16, #tpu.memory_space<vmem>>, %arg5: memref<1x32xf32, #tpu.memory_space<vmem>>, %arg6: memref<1x32xf32, #tpu.memory_space<vmem>>, %arg7: memref<1x32xf32, #tpu.memory_space<vmem>>, %arg8: memref<16x32xbf16, #tpu.memory_space<vmem>>) attributes {dimension_semantics = [#tpu.dimension_semantics<parallel>], iteration_bounds = array<i64: 1>, scalar_prefetch = 0 : i64, scratch_operands = 0 : i64, tpu.core_type = #tpu.core_type<tc>, window_params = [{transform_indices = @transform_0, window_bounds = array<i64: 16, 32>}, {pipeline_mode = #tpu.pipeline_mode<synchronous>, transform_indices = @transform_1, window_bounds = array<i64: 32, 128>}, {pipeline_mode = #tpu.pipeline_mode<synchronous>, transform_indices = @transform_2, window_bounds = array<i64: 1, 128>}, {pipeline_mode = #tpu.pipeline_mode<synchronous>, transform_indices = @transform_3, window_bounds = array<i64: 128, 32>}, {pipeline_mode = #tpu.pipeline_mode<synchronous>, transform_indices = @transform_4, window_bounds = array<i64: 1, 32>}, {pipeline_mode = #tpu.pipeline_mode<synchronous>, transform_indices = @transform_5, window_bounds = array<i64: 1, 32>}, {pipeline_mode = #tpu.pipeline_mode<synchronous>, transform_indices = @transform_6, window_bounds = array<i64: 1, 32>}, {transform_indices = @transform_7, window_bounds = array<i64: 16, 32>}]} {
    %c0 = arith.constant 0 : index
    %c0_0 = arith.constant 0 : index
    %0 = vector.load %arg1[%c0, %c0_0] : memref<16x32xbf16, #tpu.memory_space<vmem>>, vector<16x32xbf16>
    %c0_1 = arith.constant 0 : index
    %c0_2 = arith.constant 0 : index
    %1 = vector.load %arg2[%c0_1, %c0_2] : memref<32x128xbf16, #tpu.memory_space<vmem>>, vector<32x128xbf16>
    %cst = arith.constant dense<0.000000e+00> : vector<16x128xf32>
    %2 = tpu.matmul %0, %1, %cst {dimension_numbers = #tpu.dot_dimension_numbers<[1], [0], [0], [1], [0, 0, 1, 1], [], []>} : vector<16x32xbf16>, vector<32x128xbf16>, vector<16x128xf32> -> vector<16x128xf32>
    %c0_3 = arith.constant 0 : index
    %c0_4 = arith.constant 0 : index
    %3 = vector.load %arg3[%c0_3, %c0_4] : memref<1x128xf32, #tpu.memory_space<vmem>>, vector<1x128xf32>
    %4 = vector.broadcast %3 : vector<1x128xf32> to vector<16x128xf32>
    %5 = arith.addf %2, %4 : vector<16x128xf32>
    %cst_5 = arith.constant 0.000000e+00 : f32
    %6 = vector.broadcast %cst_5 : f32 to vector<16x128xf32>
    %7 = arith.maximumf %5, %6 : vector<16x128xf32>
    %8 = arith.truncf %7 : vector<16x128xf32> to vector<16x128xbf16>
    %c0_6 = arith.constant 0 : index
    %c0_7 = arith.constant 0 : index
    %9 = vector.load %arg4[%c0_6, %c0_7] : memref<128x32xbf16, #tpu.memory_space<vmem>>, vector<128x32xbf16>
    %cst_8 = arith.constant dense<0.000000e+00> : vector<16x32xf32>
    %10 = tpu.matmul %8, %9, %cst_8 {dimension_numbers = #tpu.dot_dimension_numbers<[1], [0], [0], [1], [0, 0, 1, 1], [], []>} : vector<16x128xbf16>, vector<128x32xbf16>, vector<16x32xf32> -> vector<16x32xf32>
    %c0_9 = arith.constant 0 : index
    %c0_10 = arith.constant 0 : index
    %11 = vector.load %arg5[%c0_9, %c0_10] : memref<1x32xf32, #tpu.memory_space<vmem>>, vector<1x32xf32>
    %12 = vector.broadcast %11 : vector<1x32xf32> to vector<16x32xf32>
    %13 = arith.addf %10, %12 : vector<16x32xf32>
    %14 = arith.extf %0 : vector<16x32xbf16> to vector<16x32xf32>
    %15 = arith.addf %13, %14 : vector<16x32xf32>
    %cst_11 = arith.constant dense<0.000000e+00> : vector<16xf32>
    %16 = vector.multi_reduction <add>, %15, %cst_11 [1] : vector<16x32xf32> to vector<16xf32>
    %17 = vector.shape_cast %16 : vector<16xf32> to vector<16x1xf32>
    %cst_12 = arith.constant 3.200000e+01 : f32
    %18 = vector.broadcast %cst_12 : f32 to vector<16x1xf32>
    %19 = arith.divf %17, %18 : vector<16x1xf32>
    %20 = vector.broadcast %19 : vector<16x1xf32> to vector<16x32xf32>
    %21 = arith.subf %15, %20 : vector<16x32xf32>
    %22 = arith.mulf %21, %21 : vector<16x32xf32>
    %cst_13 = arith.constant dense<0.000000e+00> : vector<16xf32>
    %23 = vector.multi_reduction <add>, %22, %cst_13 [1] : vector<16x32xf32> to vector<16xf32>
    %24 = vector.shape_cast %23 : vector<16xf32> to vector<16x1xf32>
    %cst_14 = arith.constant 3.200000e+01 : f32
    %25 = vector.broadcast %cst_14 : f32 to vector<16x1xf32>
    %26 = arith.divf %24, %25 : vector<16x1xf32>
    %cst_15 = arith.constant 9.99999974E-6 : f32
    %27 = vector.broadcast %cst_15 : f32 to vector<16x1xf32>
    %28 = arith.addf %26, %27 : vector<16x1xf32>
    %29 = math.rsqrt %28 : vector<16x1xf32>
    %30 = vector.broadcast %29 : vector<16x1xf32> to vector<16x32xf32>
    %31 = arith.mulf %21, %30 : vector<16x32xf32>
    %c0_16 = arith.constant 0 : index
    %c0_17 = arith.constant 0 : index
    %32 = vector.load %arg6[%c0_16, %c0_17] : memref<1x32xf32, #tpu.memory_space<vmem>>, vector<1x32xf32>
    %33 = vector.broadcast %32 : vector<1x32xf32> to vector<16x32xf32>
    %34 = arith.mulf %31, %33 : vector<16x32xf32>
    %c0_18 = arith.constant 0 : index
    %c0_19 = arith.constant 0 : index
    %35 = vector.load %arg7[%c0_18, %c0_19] : memref<1x32xf32, #tpu.memory_space<vmem>>, vector<1x32xf32>
    %36 = vector.broadcast %35 : vector<1x32xf32> to vector<16x32xf32>
    %37 = arith.addf %34, %36 : vector<16x32xf32>
    %38 = arith.truncf %37 : vector<16x32xf32> to vector<16x32xbf16>
    %c0_20 = arith.constant 0 : index
    %c0_21 = arith.constant 0 : index
    %39 = vector.load %arg8[%c0_20, %c0_21] : memref<16x32xbf16, #tpu.memory_space<vmem>>, vector<16x32xbf16>
    tpu.vector_store %arg8[%c0_20, %c0_21], %38 {strides = array<i32>} : memref<16x32xbf16, #tpu.memory_space<vmem>>, vector<16x32xbf16>,
    return
  }
  func.func @transform_0(%arg0: i32) -> (i32, i32) {
    %c0_i32 = arith.constant 0 : i32
    %c0_i32_0 = arith.constant 0 : i32
    return %arg0, %c0_i32 : i32, i32
  }
  func.func @transform_1(%arg0: i32) -> (i32, i32) {
    %c0_i32 = arith.constant 0 : i32
    %c0_i32_0 = arith.constant 0 : i32
    %c0_i32_1 = arith.constant 0 : i32
    return %c0_i32, %c0_i32_0 : i32, i32
  }
  func.func @transform_2(%arg0: i32) -> (i32, i32) {
    %c0_i32 = arith.constant 0 : i32
    %c0_i32_0 = arith.constant 0 : i32
    %c0_i32_1 = arith.constant 0 : i32
    return %c0_i32, %c0_i32_0 : i32, i32
  }
  func.func @transform_3(%arg0: i32) -> (i32, i32) {
    %c0_i32 = arith.constant 0 : i32
    %c0_i32_0 = arith.constant 0 : i32
    %c0_i32_1 = arith.constant 0 : i32
    return %c0_i32, %c0_i32_0 : i32, i32
  }
  func.func @transform_4(%arg0: i32) -> (i32, i32) {
    %c0_i32 = arith.constant 0 : i32
    %c0_i32_0 = arith.constant 0 : i32
    %c0_i32_1 = arith.constant 0 : i32
    return %c0_i32, %c0_i32_0 : i32, i32
  }
  func.func @transform_5(%arg0: i32) -> (i32, i32) {
    %c0_i32 = arith.constant 0 : i32
    %c0_i32_0 = arith.constant 0 : i32
    %c0_i32_1 = arith.constant 0 : i32
    return %c0_i32, %c0_i32_0 : i32, i32
  }
  func.func @transform_6(%arg0: i32) -> (i32, i32) {
    %c0_i32 = arith.constant 0 : i32
    %c0_i32_0 = arith.constant 0 : i32
    %c0_i32_1 = arith.constant 0 : i32
    return %c0_i32, %c0_i32_0 : i32, i32
  }
  func.func @transform_7(%arg0: i32) -> (i32, i32) {
    %c0_i32 = arith.constant 0 : i32
    %c0_i32_0 = arith.constant 0 : i32
    return %arg0, %c0_i32 : i32, i32
  }
}

</mosaic_0001>

<bundles_post_ra>
// kernel: gtransformer_forward.13
= control target key start
LH: loop header
LB: loop body
LE: loop exit
PB: predicated region body
PF: predicated region fallthrough
CT: control target
= control target key end

     0   :  { %v185_v1 = vmov 0.0   ;;  %vm186_vm0 = vmmov 0   ;;  %s234_s0 = inlined_call_operand.vmem [shape: bf16[16,32], index: 0, kind: input, shape index: {}]   ;;  %s235_s1 = inlined_call_operand.vmem [shape: bf16[32,128], index: 1, kind: input, shape index: {}]   ;;  %s236_s2 = inlined_call_operand.vmem [shape: f32[1,128], index: 2, kind: input, shape index: {}]   ;;  %s237_s3 = inlined_call_operand.hbm [shape: f32[16,128], index: 3, kind: output, shape index: {}]  }
   0x1   :  { %v150_v0 = vld [vmem:[%s235_s1] sm:$0xff]   ;;  %137 = vmatprep.subr.bf16.mxu0 %v185_v1  ;;  %v151_v2 = vld [vmem:[%s235_s1 + $0x8] sm:$0xff]   ;;  %141 = vmatprep.mubr.msk.bf16.mxu0 %vm186_vm0, %v185_v1 }
   0x2   :  { %138 = vmatpush3.bf16.msra.mxu0 %v150_v0 }
   0x3   :  { %139 = vmatprep.subr.bf16.mxu0 %v185_v1 }
   0x4   :  { %8 = vsyncpa [#allocation3], 0  ;;  %v152_v3 = vld [vmem:[%s234_s0] sm:$0xff]   ;;  %vm46_vm1 = vcmask 261120   ;;  %s187_s0 = smov [#allocation2]  }
   0x5   :  { %v129_v4 = vld [vmem:[%s236_s2] ss:$0 sm:$0xff]  ;;  %s118_s1 = sshll.u32 %s187_s0, 4  ;;  %s119_s1 = int_to_ptr.vmem [resolvable:$true] %s118_s1 }
   0x6   :  { %140 = vmatpush3.bf16.msra.mxu0 %v151_v2  ;;  %s161_s2 = scalar_lea.vmem %s119_s1, 256  ;;  %p166_p1 = scmp.lt.s32.totalorder %s119_s1, %s119_s1 }
   0x7   :  { %p162_p0 = scmp.ne.s32.totalorder %s119_s1, %s161_s2  ;;  %p167_p2 = scmp.lt.s32.totalorder %s161_s2, %s161_s2 }
   0x9   :  { %142 = vmatmul.mubr.msk.bf16.vlgmr.msra.gmra.mrb[0].mxu0 %vm46_vm1, %v152_v3  ;;  %p168_p3 = por %p167_p2, %p166_p1 }
   0xb   :  { %p169_p4 = pnand %p168_p3, %p162_p0 }
  0xdc   :  { %v84_v5 = vpop.f32.mrb[0].mxu0 }
  0xdd   :  { %v85_v6 = vadd.f32 %v129_v4, %v84_v5  ;;  %v143_v7 = vpop.f32.mrb[1].mxu0 }
  0xde   :  { %v87_v8 = vpop.f32.mrb[2].mxu0 }
  0xdf   :  { %91 = vmax.xlane.f32.xlu0 %v85_v6  ;;  %v144_v9 = vpop.f32.mrb[3].mxu0  ;;  %v88_v10 = vadd.f32 %v129_v4, %v87_v8 }
  0xe3   :  { %93 = vmax.xlane.f32.xlu0 %v88_v10 }
 0x16c   :  { %v92_v11 = vpop.xlane.xlu0 %91 }
 0x16d   :  { %v95_v12 = vsub.f32 %v85_v6, %v92_v11 }
 0x16f   :  { %v97_v13 = vmul.f32 1.442695, %v95_v12 }
 0x170   :  { %v94_v14 = vpop.xlane.xlu0 %93 }
 0x171   :  { %v96_v15 = vsub.f32 %v88_v10, %v94_v14  ;;  %153 = vpow2.f32 %v97_v13 }
 0x173   :  { %v99_v16 = vmul.f32 1.442695, %v96_v15 }
 0x175   :  { %155 = vpow2.f32 %v99_v16 }
 0x17b   :  { %v154_v17 = vpop.eup %153 }
 0x17c   :  { %101 = vadd.xlane.f32.xlu1 %v154_v17 }
 0x17f   :  { %v156_v18 = vpop.eup %155 }
 0x180   :  { %103 = vadd.xlane.f32.xlu1 %v156_v18 }
 0x209   :  { %v102_v19 = vpop.xlane.xlu1 %101 }
 0x20a   :  { %157 = vlog2.f32 %v102_v19 }
 0x20d   :  { %v104_v20 = vpop.xlane.xlu1 %103 }
 0x20e   :  { %159 = vlog2.f32 %v104_v20 }
 0x214   :  { %v158_v21 = vpop.eup %157 }
 0x215   :  { %v106_v22 = vmul.f32 0.6931472, %v158_v21 }
 0x217   :  { %v109_v23 = vsub.f32 %v95_v12, %v106_v22 }
 0x218   :  { %v160_v24 = vpop.eup %159 }
 0x219   :  { %111 = vst [vmem:[#allocation2] sm:$0xff] %v109_v23  ;;  %v108_v25 = vmul.f32 0.6931472, %v160_v24 }
 0x21b   :  { %v110_v26 = vsub.f32 %v96_v15, %v108_v25 }
 0x21d   :  { %112 = vst [vmem:[#allocation2 + $0x8] sm:$0xff] %v110_v26 }
 0x21e   :  { %172 = shalt.err (!%p169_p4)
}
 0x21f   :  { %s173_s22 = scalar_lea.hbm %s237_s3, 256 }
 0x220   :  { %p174_p5 = scmp.ne.s32.totalorder %s237_s3, %s173_s22  ;;  %p177_p6 = scmp.lt.u32.totalorder %s173_s22, %s237_s3 }
 0x222   :  { %p179_p7 = pnand %p177_p6, %p174_p5 }
 0x224   :  { %182 = shalt.err (!%p179_p7)
}
 0x225   :  { %s188_s27 = smov 128   ;;  %s189_s28 = smov 8  }
 0x226   :  { %124 = dma.vmem_to_hbm [thread:$0]  %s119_s1, 256, %s237_s3, [#allocation3], %s188_s27, %s188_s27, %s189_s28  }
 0x227   :  { %183 = dma.done.wait [#allocation3], 256  }
 0x228   :  { %184 = vsyncadd [#allocation3], 4294967040 }
 0x229   :  { %128 = vsyncpa [#allocation3], 1 }

// kernel: gtransformer_forward.8
= control target key start
LH: loop header
LB: loop body
LE: loop exit
PB: predicated region body
PF: predicated region fallthrough
CT: control target
= control target key end

     0   :  { %vm28_vm0 = vcmask 261120   ;;  %v295_v0 = vmov 0.0   ;;  %vm296_vm1 = vmmov 0   ;;  %vm224_vm2 = vcmask 257024   ;;  %s385_s1 = inlined_call_operand.vmem [shape: bf16[128,32], index: 1, kind: input, shape index: {}]   ;;  %s386_s0 = inlined_call_operand.vmem [shape: bf16[16,128], index: 0, kind: input, shape index: {}]   ;;  %s387_s3 = inlined_call_operand.vmem [shape: bf16[16,32], index: 3, kind: input, shape index: {}]   ;;  %s388_s2 = inlined_call_operand.vmem [shape: f32[1,32], index: 2, kind: input, shape index: {}]   ;;  %s389_s4 = inlined_call_operand.vmem [shape: f32[1,32], index: 4, kind: input, shape index: {}]   ;;  %s390_s5 = inlined_call_operand.vmem [shape: f32[1,32], index: 5, kind: input, shape index: {}]   ;;  %s391_s6 = inlined_call_operand.vmem [shape: bf16[16,32], index: 6, kind: output, shape index: {}]  }
   0x1   :  { %260 = vmatprep.subr.bf16.mxu0 %v295_v0  ;;  %v282_v1 = vld [vmem:[%s385_s1] sm:$0xff]   ;;  %276 = vmatprep.mubr.msk.bf16.mxu0 %vm296_vm1, %v295_v0  ;;  %29 = vst.msk [vmem:[#allocation2] sm:$0xff] %vm28_vm0, %v295_v0  ;;  %30 = vst.msk [vmem:[#allocation2 + $0x8] sm:$0xff] %vm28_vm0, %v295_v0  ;;  %v283_v2 = vld [vmem:[%s385_s1 + $0x8] sm:$0xff]  }
   0x2   :  { %261 = vmatpush3.bf16.msra.mxu0 %v282_v1  ;;  %v284_v3 = vld [vmem:[%s385_s1 + $0x10] sm:$0xff]   ;;  %v285_v4 = vld [vmem:[%s385_s1 + $0x18] sm:$0xff]   ;;  %v286_v5 = vld [vmem:[%s385_s1 + $0x20] sm:$0xff]  }
   0x3   :  { %262 = vmatprep.subr.bf16.mxu0 %v295_v0  ;;  %v287_v6 = vld [vmem:[%s385_s1 + $0x28] sm:$0xff]   ;;  %v288_v7 = vld [vmem:[%s385_s1 + $0x30] sm:$0xff]   ;;  %v289_v8 = vld [vmem:[%s385_s1 + $0x38] sm:$0xff]  }
   0x4   :  { %v290_v9 = vld [vmem:[%s386_s0] sm:$0xff]  }
   0x5   :  { %v248_v18 = vld [vmem:[%s387_s3] sm:$0xff]  }
   0x6   :  { %263 = vmatpush3.bf16.msra.mxu0 %v283_v2  ;;  %v240_v19 = vld [vmem:[%s388_s2] ss:$0 sm:$0xff]  ;;  %v249_v20 = vunpack.c.l.bf16 %v248_v18  ;;  %v250_v23 = vunpack.c.h.bf16 %v248_v18 }
   0x7   :  { %264 = vmatprep.subr.bf16.mxu0 %v295_v0  ;;  %v241_v47 = vld [vmem:[%s389_s4] ss:$0 sm:$0xff] }
   0x8   :  { %v31_v10 = vld [vmem:[#allocation2] sm:$0xff]  ;;  %v32_v12 = vld [vmem:[#allocation2 + $0x8] sm:$0xff] }
   0x9   :  { %v242_v49 = vld [vmem:[%s390_s5] ss:$0 sm:$0xff] }
   0xa   :  { %265 = vmatpush3.bf16.msra.mxu0 %v284_v3 }
   0xb   :  { %266 = vmatprep.subr.bf16.mxu0 %v295_v0 }
   0xe   :  { %267 = vmatpush3.bf16.msra.mxu0 %v285_v4 }
   0xf   :  { %268 = vmatprep.subr.bf16.mxu0 %v295_v0 }
  0x12   :  { %269 = vmatpush3.bf16.msra.mxu0 %v286_v5 }
  0x13   :  { %270 = vmatprep.subr.bf16.mxu0 %v295_v0 }
  0x16   :  { %271 = vmatpush3.bf16.msra.mxu0 %v287_v6 }
  0x17   :  { %272 = vmatprep.subr.bf16.mxu0 %v295_v0 }
  0x1a   :  { %273 = vmatpush3.bf16.msra.mxu0 %v288_v7 }
  0x1b   :  { %274 = vmatprep.subr.bf16.mxu0 %v295_v0 }
  0x1e   :  { %275 = vmatpush3.bf16.msra.mxu0 %v289_v8 }
  0x21   :  { %277 = vmatmul.mubr.bf16.vlgmr.msra.gmra.mrb[0].mxu0 %v290_v9 }
  0xf4   :  { %v139_v11 = vpop.f32.mrb[0].mxu0 }
  0xf5   :  { %v146_v13 = vadd.f32 %v139_v11, %v31_v10  ;;  %v278_v14 = vpop.f32.mrb[1].mxu0 }
  0xf6   :  { %v142_v15 = vpop.f32.mrb[2].mxu0 }
  0xf7   :  { %149 = vst.msk [vmem:[#allocation2] sm:$0xff] %vm28_vm0, %v146_v13  ;;  %v147_v16 = vadd.f32 %v142_v15, %v32_v12  ;;  %v279_v17 = vpop.f32.mrb[3].mxu0 }
  0xf9   :  { %150 = vst.msk [vmem:[#allocation2 + $0x8] sm:$0xff] %vm28_vm0, %v147_v16 }
  0xfe   :  { %v154_v21 = vld [vmem:[#allocation2] sm:$0xff] }
  0xff   :  { %v163_v22 = vadd.f32 %v240_v19, %v154_v21 }
 0x100   :  { %v155_v24 = vld [vmem:[#allocation2 + $0x8] sm:$0xff] }
 0x101   :  { %v169_v25 = vadd.f32 %v249_v20, %v163_v22  ;;  %v164_v26 = vadd.f32 %v240_v19, %v155_v24 }
 0x103   :  { %v171_v27 = vsel %vm28_vm0, %v169_v25, 0.0  ;;  %v170_v28 = vadd.f32 %v250_v23, %v164_v26 }
 0x104   :  { %172 = vadd.xlane.f32.xlu0 %v171_v27 }
 0x105   :  { %v174_v29 = vsel %vm28_vm0, %v170_v28, 0.0 }
 0x108   :  { %175 = vadd.xlane.f32.xlu0 %v174_v29 }
 0x191   :  { %v173_v30 = vpop.xlane.xlu0 %172 }
 0x192   :  { %v178_v31 = vmul.f32 0.03125, %v173_v30 }
 0x194   :  { %v180_v32 = vsub.f32 %v169_v25, %v178_v31 }
 0x195   :  { %v176_v33 = vpop.xlane.xlu0 %175 }
 0x196   :  { %v179_v34 = vmul.f32 0.03125, %v176_v33  ;;  %v182_v35 = vmul.f32 %v180_v32, %v180_v32 }
 0x198   :  { %v181_v36 = vsub.f32 %v170_v28, %v179_v34  ;;  %v184_v37 = vsel %vm28_vm0, %v182_v35, 0.0 }
 0x199   :  { %185 = vadd.xlane.f32.xlu1 %v184_v37 }
 0x19a   :  { %v183_v38 = vmul.f32 %v181_v36, %v181_v36 }
 0x19c   :  { %v187_v39 = vsel %vm28_vm0, %v183_v38, 0.0 }
 0x19d   :  { %188 = vadd.xlane.f32.xlu1 %v187_v39 }
 0x226   :  { %v186_v40 = vpop.xlane.xlu1 %185 }
 0x227   :  { %v190_v41 = vmul.f32 0.03125, %v186_v40 }
 0x229   :  { %v192_v42 = vadd.f32 1e-05, %v190_v41 }
 0x22a   :  { %v189_v43 = vpop.xlane.xlu1 %188 }
 0x22b   :  { %291 = vrsqrt.f32 %v192_v42  ;;  %v191_v44 = vmul.f32 0.03125, %v189_v43 }
 0x22d   :  { %v193_v45 = vadd.f32 1e-05, %v191_v44 }
 0x22f   :  { %293 = vrsqrt.f32 %v193_v45 }
 0x235   :  { %v292_v46 = vpop.eup %291 }
 0x236   :  { %v196_v48 = vmul.f32 %v292_v46, %v180_v32 }
 0x238   :  { %v205_v50 = vmul.f32 %v241_v47, %v196_v48 }
 0x239   :  { %v294_v51 = vpop.eup %293 }
 0x23a   :  { %v214_v52 = vadd.f32 %v242_v49, %v205_v50  ;;  %v197_v53 = vmul.f32 %v294_v51, %v181_v36 }
 0x23c   :  { %v245_v54 = vpack.c.bf16 %v214_v52, %v214_v52  ;;  %v206_v55 = vmul.f32 %v241_v47, %v197_v53 }
 0x23e   :  { %225 = vst.msk [vmem:[%s391_s6] sm:$0xf] %vm224_vm2, %v245_v54  ;;  %v215_v56 = vadd.f32 %v242_v49, %v206_v55 }
 0x240   :  { %v246_v57 = vpack.c.bf16 %v215_v56, %v215_v56 }
 0x242   :  { %226 = vst.msk [vmem:[%s391_s6 + $0x4] sm:$0xf] %vm224_vm2, %v246_v57 }

// kernel: gtransformer_forward.7
= control target key start
LH: loop header
LB: loop body
LE: loop exit
PB: predicated region body
PF: predicated region fallthrough
CT: control target
= control target key end

     0   :  { %s1410_s15 = smov 0   ;;  %s1412_s16 = smov 0   ;;  %s1595_s0 = inlined_call_operand.vmem [shape: bf16[2,8,32], index: 0, kind: input, shape index: {}]   ;;  %s1596_s1 = inlined_call_operand.vmem [shape: bf16[32,384], index: 1, kind: input, shape index: {}, may-alias: {1,2,3}]   ;;  %s1597_s2 = inlined_call_operand.vmem [shape: bf16[32,384], index: 2, kind: input, shape index: {}, may-alias: {1,2,3}]   ;;  %s1598_s3 = inlined_call_operand.vmem [shape: bf16[32,384], index: 3, kind: input, shape index: {}, may-alias: {1,2,3}]   ;;  %s1599_s4 = inlined_call_operand.vmem [shape: bf16[2,8,128], index: 4, kind: output, shape index: {}]  }
   0x1   :  { %s1414_s17 = smov 0  }
   0x2 LB: > { %s1171_s18 = sadd.s32 4294967295, %s1378_s17   ;;  %s23_s19 = sadd.s32 1, %s1374_s16  ;;  %s1378_s17 = sphi %s1414_s17, %s14_s17   ;;  %s1374_s16 = sphi %s1412_s16, %s1603_s16   ;;  %s1370_s15 = sphi %s1410_s15, %s1602_s15  }
   0x3   : > { %p24_p0 = scmp.ge.s32.totalorder %s23_s19, 2  ;;  %p1173_p1 = scmp.ge.s32.totalorder %s1378_s17, 1 }
   0x4   : > { %p167_p2 = scmp.lt.s32.totalorder %s1378_s17, 3 }
   0x5   : > { %s1605_s19 = smov (%p24_p0, %s23_s19), 0 }
   0x6   : > { %p1431_p3 = pnand %p1173_p1, %p167_p2 }
   0x7   : > { %p1437_p4 = scmp.ne.s32.totalorder (!%p1431_p3), %s1171_s18, 0 }
   0x8   : > { %171 = sbr.rel (%p1431_p3) target bundleno = 36 (0x24), region = 12 }
   0xf   : > { %175 = sbr.rel (%p1437_p4) target bundleno = 22 (0x16), region = 16  ;;  %v193_v0 = vld [vmem:[%s1596_s1] sm:$0xf] (!%p1437_p4)  ;;  %v195_v1 = vld [vmem:[%s1596_s1 + $0xc] sm:$0xf] (!%p1437_p4) }
  0x10   : > { %v197_v2 = vld [vmem:[%s1596_s1 + $0x18] sm:$0xf] (!%p1437_p4)  ;;  %194 = vst [vmem:[#allocation2] sm:$0xf] (!%p1437_p4), %v193_v0  ;;  %196 = vst [vmem:[#allocation2 + $0x4] sm:$0xf] (!%p1437_p4), %v195_v1 }
  0x11   : > { %198 = vst [vmem:[#allocation2 + $0x8] sm:$0xf] (!%p1437_p4), %v197_v2  ;;  %v199_v3 = vld [vmem:[%s1596_s1 + $0x24] sm:$0xf] (!%p1437_p4) }
  0x12   : > { %200 = vst [vmem:[#allocation2 + $0xc] sm:$0xf] (!%p1437_p4), %v199_v3 }
  0x16 PF: > { %231 = sbr.rel (%p1437_p4) target bundleno = 29 (0x1d), region = 57  ;;  %v1176_v4 = vld [vmem:[%s1597_s2 + $0x4] sm:$0xf] (!%p1437_p4)  ;;  %v1177_v5 = vld [vmem:[%s1597_s2 + $0x10] sm:$0xf] (!%p1437_p4) }
  0x17   : > { %v1178_v6 = vld [vmem:[%s1597_s2 + $0x1c] sm:$0xf] (!%p1437_p4)  ;;  %251 = vst [vmem:[#allocation3] sm:$0xf] (!%p1437_p4), %v1176_v4  ;;  %253 = vst [vmem:[#allocation3 + $0x4] sm:$0xf] (!%p1437_p4), %v1177_v5 }
  0x18   : > { %255 = vst [vmem:[#allocation3 + $0x8] sm:$0xf] (!%p1437_p4), %v1178_v6  ;;  %v1179_v7 = vld [vmem:[%s1597_s2 + $0x28] sm:$0xf] (!%p1437_p4) }
  0x19   : > { %257 = vst [vmem:[#allocation3 + $0xc] sm:$0xf] (!%p1437_p4), %v1179_v7 }
  0x1d PF: > { %288 = sbr.rel (%p1437_p4) target bundleno = 36 (0x24), region = 98  ;;  %v1181_v8 = vld [vmem:[%s1598_s3 + $0x8] sm:$0xf] (!%p1437_p4)  ;;  %v1182_v9 = vld [vmem:[%s1598_s3 + $0x14] sm:$0xf] (!%p1437_p4) }
  0x1e   : > { %v1183_v10 = vld [vmem:[%s1598_s3 + $0x20] sm:$0xf] (!%p1437_p4)  ;;  %308 = vst [vmem:[#allocation4] sm:$0xf] (!%p1437_p4), %v1181_v8  ;;  %310 = vst [vmem:[#allocation4 + $0x4] sm:$0xf] (!%p1437_p4), %v1182_v9 }
  0x1f   : > { %312 = vst [vmem:[#allocation4 + $0x8] sm:$0xf] (!%p1437_p4), %v1183_v10  ;;  %v1184_v11 = vld [vmem:[%s1598_s3 + $0x2c] sm:$0xf] (!%p1437_p4) }
  0x20   : > { %314 = vst [vmem:[#allocation4 + $0xc] sm:$0xf] (!%p1437_p4), %v1184_v11 }
  0x24 PF: > { %359 = sbr.rel (%p1431_p3) target bundleno = 1263 (0x4ef), region = 147  ;;  %v1334_v12 = vld [vmem:[#allocation3] sm:$0xff] (!%p1431_p3)   ;;  %v1380_v13 = vmov (!%p1431_p3), 0.0   ;;  %v1335_v14 = vld [vmem:[#allocation2] sm:$0xff] (!%p1431_p3)   ;;  %v1336_v15 = vld [vmem:[#allocation3 + $0x8] sm:$0xff] (!%p1431_p3)   ;;  %vm1381_vm0 = vmmov (!%p1431_p3), 0   ;;  %v581_v40 = vlaneseq (!%p1431_p3) }
  0x25   : > { %1241 = vmatprep.subr.bf16.mxu1 (!%p1431_p3), %v1380_v13  ;;  %1233 = vmatprep.subr.bf16.mxu0 (!%p1431_p3), %v1380_v13  ;;  %p391_p5 = scmp.lt.s32.totalorder (!%p1431_p3), %s1370_s15, 1  ;;  %v1337_v16 = vld [vmem:[#allocation2 + $0x8] sm:$0xff] (!%p1431_p3)   ;;  %vm422_vm1 = vcmask (!%p1431_p3), 261120   ;;  %s1382_s28 = smov (!%p1431_p3), 64   ;;  %v1338_v29 = vld [vmem:[#allocation4] sm:$0xff] (!%p1431_p3)   ;;  %vm634_vm3 = vcmask (!%p1431_p3), 64512  }
  0x26   : > { %1242 = vmatpush3.bf16.msra.mxu1 (!%p1431_p3), %v1334_v12  ;;  %1245 = vmatprep.mubr.msk.bf16.mxu1 (!%p1431_p3), %vm1381_vm0, %v1380_v13  ;;  %s1383_s29 = smov (!%p1431_p3), 96   ;;  %s1384_s30 = smov (!%p1431_p3), 32   ;;  %v582_v41 = vshrl.u32 (!%p1431_p3), %v581_v40, 7  ;;  %v584_v42 = vand.u32 (!%p1431_p3), 127, %v581_v40  ;;  %vm650_vm4 = vcmask (!%p1431_p3), 1043456   ;;  %vm1046_vm5 = vcmask (!%p1431_p3), 523264  }
  0x27   : > { %1243 = vmatprep.subr.bf16.mxu1 (!%p1431_p3), %v1380_v13  ;;  %1234 = vmatpush3.bf16.msra.mxu0 (!%p1431_p3), %v1335_v14  ;;  %v1339_v30 = vld [vmem:[#allocation4 + $0x8] sm:$0xff] (!%p1431_p3)   ;;  %vm1048_vm6 = vcmask (!%p1431_p3), 785408  }
  0x28   : > { %1235 = vmatprep.subr.bf16.mxu0 (!%p1431_p3), %v1380_v13  ;;  %1237 = vmatprep.mubr.msk.bf16.mxu0 (!%p1431_p3), %vm1381_vm0, %v1380_v13  ;;  %vm585_vm2 = vcmp.gt.s32.totalorder (!%p1431_p3), %v584_v42, %v582_v41 }
  0x2a   : > { %1244 = vmatpush3.bf16.msra.mxu1 (!%p1431_p3), %v1336_v15 }
  0x2b   : > { %s1607_s15 = smov (!%p391_p5, %s1370_s15), 1  ;;  %1236 = vmatpush3.bf16.msra.mxu0 %v1337_v16  ;;  %1257 = vmatprep.subr.bf16.mxu1 %v1380_v13 }
  0x2c   : > { %s1187_s20 = sshll.u32 %s1607_s15, 2  ;;  %1249 = vmatprep.subr.bf16.mxu0 %v1380_v13 }
  0x2d   : > { %s394_s27 = scalar_lea.vmem %s1595_s0, %s1187_s20  ;;  %s403_s7 = scalar_lea.vmem %s1599_s4, %s1187_s20 }
  0x2e   : > { %v405_v17 = vld [vmem:[%s394_s27] sm:$0xf] }
  0x2f   : > { %1246 = vmatmul.mubr.msk.bf16.vlgmr.msra.gmra.mrb[0].mxu1 %vm422_vm1, %v405_v17  ;;  %1238 = vmatmul.mubr.msk.bf16.vlgmr.msra.gmra.mrb[0].mxu0 %vm422_vm1, %v405_v17 }
  0x30   : > { %1259 = vmatprep.mubr.msk.bf16.mxu1 %vm1381_vm0, %v1380_v13  ;;  %1253 = vmatprep.mubr.msk.bf16.mxu0 %vm1381_vm0, %v1380_v13 }
  0x31   : > { %1250 = vmatpush3.bf16.msra.mxu0 %v1338_v29 }
  0x32   : > { %1251 = vmatprep.subr.bf16.mxu0 %v1380_v13 }
  0x35   : > { %1252 = vmatpush3.bf16.msra.mxu0 %v1339_v30 }
  0x36   : > { %1263 = vmatprep.subr.bf16.mxu0 %v1380_v13 }
  0x38   : > { %1254 = vmatmul.mubr.msk.bf16.vlgmr.msra.gmra.mrb[4].mxu0 %vm422_vm1, %v405_v17 }
  0x39   : > { %1265 = vmatprep.mubr.msk.bf16.mxu0 %vm1381_vm0, %v1380_v13 }
 0x102   : > { %v517_v18 = vpop.f32.mrb[0].mxu1  ;;  %v460_v21 = vpop.f32.mrb[0].mxu0 }
 0x103   : > { %v523_v19 = vpack.c.bf16 %v517_v18, %v517_v18  ;;  %v1247_v20 = vpop.f32.mrb[1].mxu1  ;;  %v1239_v23 = vpop.f32.mrb[1].mxu0  ;;  %v466_v25 = vpack.c.bf16 %v460_v21, %v460_v21 }
 0x104   : > { %v520_v22 = vpop.f32.mrb[2].mxu1  ;;  %v463_v27 = vpop.f32.mrb[2].mxu0 }
 0x105   : > { %811 = vrot.lane.b32.xlu1 %v523_v19, %s1382_s28  ;;  %698 = vrot.lane.b32.xlu0 %v523_v19, %s1383_s29  ;;  %v1248_v24 = vpop.f32.mrb[3].mxu1  ;;  %v590_v26 = vsel %vm422_vm1, %v523_v19, 0  ;;  %v1240_v28 = vpop.f32.mrb[3].mxu0 }
 0x106   : > { %1258 = vmatpush3.bf16.xpose.msra.mxu1 %v590_v26 }
 0x107   : > { %1269 = vmatprep.subr.bf16.mxu1 %v1380_v13 }
 0x109   : > { %809 = vrot.lane.b32.xlu1 %v466_v25, %s1382_s28  ;;  %695 = vrot.lane.b32.xlu0 %v466_v25, %s1383_s29 }
 0x10b   : > { %v574_v50 = vpop.f32.mrb[4].mxu0 }
 0x10c   : > { %v1541_v51 = vpack.c.bf16 %v574_v50, %v574_v50  ;;  %v1255_v52 = vpop.f32.mrb[5].mxu0 }
 0x10d   : > { %921 = vrot.lane.b32.xlu1 %v466_v25, %s1384_s30  ;;  %923 = vrot.lane.b32.xlu0 %v523_v19, %s1384_s30  ;;  %v577_v53 = vpop.f32.mrb[6].mxu0 }
 0x10e   : > { %1260 = vmatmul.mubr.msk.bf16.vlgmr.msra.gmra.mrb[4].mxu1 %vm422_vm1, %v466_v25  ;;  %v1256_v54 = vpop.f32.mrb[7].mxu0  ;;  %v652_v55 = vsel %vm650_vm4, %v1541_v51, 0 }
 0x10f   : > { %1271 = vmatprep.mubr.msk.bf16.mxu1 %vm1381_vm0, %v1380_v13  ;;  %1264 = vmatpush3.bf16.msra.mxu0 %v652_v55 }
 0x110   : > { %1275 = vmatprep.subr.bf16.mxu0 %v1380_v13 }
 0x177   : > { %v699_v31 = vpop.permute.xlu0 %698  ;;  %v812_v33 = vpop.permute.xlu1 %811 }
 0x178   : > { %v704_v32 = vsel %vm422_vm1, %v699_v31, 0  ;;  %v817_v35 = vsel %vm422_vm1, %v812_v33, 0 }
 0x179   : > { %1270 = vmatpush3.bf16.xpose.msra.mxu1 %v704_v32 }
 0x17a   : > { %1281 = vmatprep.subr.bf16.mxu1 %v1380_v13 }
 0x17b   : > { %v696_v34 = vpop.permute.xlu0 %695  ;;  %v810_v37 = vpop.permute.xlu1 %809 }
 0x17f   : > { %v924_v36 = vpop.permute.xlu0 %923  ;;  %v922_v39 = vpop.permute.xlu1 %921 }
 0x180   : > { %1272 = vmatmul.mubr.msk.bf16.vlgmr.msra.gmra.mrb[8].mxu1 %vm422_vm1, %v696_v34  ;;  %v929_v38 = vsel %vm422_vm1, %v924_v36, 0 }
 0x181   : > { %1282 = vmatpush3.bf16.xpose.msra.mxu1 %v817_v35  ;;  %1283 = vmatprep.mubr.msk.bf16.mxu1 %vm1381_vm0, %v1380_v13 }
 0x182   : > { %1293 = vmatprep.subr.bf16.mxu1 %v1380_v13 }
 0x188   : > { %1284 = vmatmul.mubr.msk.bf16.vlgmr.msra.gmra.mrb[12].mxu1 %vm422_vm1, %v810_v37 }
 0x189   : > { %1294 = vmatpush3.bf16.xpose.msra.mxu1 %v929_v38  ;;  %1295 = vmatprep.mubr.msk.bf16.mxu1 %vm1381_vm0, %v1380_v13 }
 0x190   : > { %1296 = vmatmul.mubr.msk.bf16.vlgmr.msra.gmra.mrb[16].mxu1 %vm422_vm1, %v922_v39 }
 0x1e1   : > { %v626_v43 = vpop.f32.mrb[4].mxu1 }
 0x1e2   : > { %v632_v44 = vmul.f32 0.17677669, %v626_v43  ;;  %v1261_v45 = vpop.f32.mrb[5].mxu1 }
 0x1e3   : > { %v629_v46 = vpop.f32.mrb[6].mxu1 }
 0x1e4   : > { %v1262_v47 = vpop.f32.mrb[7].mxu1  ;;  %v633_v48 = vsel %vm585_vm2, -1e+30, %v632_v44 }
 0x1e5   : > { %v635_v49 = vsel %vm634_vm3, %v633_v48, -inf }
 0x1e6   : > { %636 = vmax.xlane.f32.xlu0 %v635_v49 }
 0x253   : > { %v740_v56 = vpop.f32.mrb[8].mxu1 }
 0x254   : > { %v746_v57 = vmul.f32 0.17677669, %v740_v56  ;;  %v1273_v58 = vpop.f32.mrb[9].mxu1 }
 0x255   : > { %v743_v59 = vpop.f32.mrb[10].mxu1 }
 0x256   : > { %v1274_v60 = vpop.f32.mrb[11].mxu1  ;;  %v747_v61 = vsel %vm585_vm2, -1e+30, %v746_v57 }
 0x257   : > { %v748_v62 = vsel %vm634_vm3, %v747_v61, -inf }
 0x258   : > { %749 = vmax.xlane.f32.xlu1 %v748_v62 }
 0x25b   : > { %v853_v63 = vpop.f32.mrb[12].mxu1 }
 0x25c   : > { %v859_v0 = vmul.f32 0.17677669, %v853_v63  ;;  %v1285_v1 = vpop.f32.mrb[13].mxu1 }
 0x25d   : > { %v856_v2 = vpop.f32.mrb[14].mxu1 }
 0x25e   : > { %v1286_v3 = vpop.f32.mrb[15].mxu1  ;;  %v860_v4 = vsel %vm585_vm2, -1e+30, %v859_v0 }
 0x25f   : > { %v861_v5 = vsel %vm634_vm3, %v860_v4, -inf }
 0x260   : > { %862 = vmax.xlane.f32.xlu0 %v861_v5 }
 0x263   : > { %v965_v6 = vpop.f32.mrb[16].mxu1 }
 0x264   : > { %v971_v7 = vmul.f32 0.17677669, %v965_v6  ;;  %v1297_v8 = vpop.f32.mrb[17].mxu1 }
 0x265   : > { %v968_v9 = vpop.f32.mrb[18].mxu1 }
 0x266   : > { %v1298_v10 = vpop.f32.mrb[19].mxu1  ;;  %v972_v11 = vsel %vm585_vm2, -1e+30, %v971_v7 }
 0x267   : > { %v973_v12 = vsel %vm634_vm3, %v972_v11, -inf }
 0x268   : > { %974 = vmax.xlane.f32.xlu0 %v973_v12 }
 0x273   : > { %v637_v14 = vpop.xlane.xlu0 %636 }
 0x274   : > { %v638_v15 = vsub.f32 %v633_v48, %v637_v14 }
 0x276   : > { %v639_v16 = vmul.f32 1.442695, %v638_v15 }
 0x278   : > { %1340 = vpow2.f32 %v639_v16 }
 0x282   : > { %v1341_v17 = vpop.eup %1340 }
 0x283   : > { %v641_v18 = vsel %vm634_vm3, %v1341_v17, 0.0 }
 0x284   : > { %642 = vadd.xlane.f32.xlu1 %v641_v18 }
 0x295   : > { %761 = vrot.lane.b32.xlu1 %v1541_v51, %s1383_s29 }
 0x2e5   : > { %v750_v19 = vpop.xlane.xlu1 %749 }
 0x2e6   : > { %v751_v20 = vsub.f32 %v747_v61, %v750_v19 }
 0x2e8   : > { %v752_v21 = vmul.f32 1.442695, %v751_v20 }
 0x2ea   : > { %1342 = vpow2.f32 %v752_v21 }
 0x2ed   : > { %v863_v22 = vpop.xlane.xlu0 %862 }
 0x2ee   : > { %v864_v23 = vsub.f32 %v860_v4, %v863_v22 }
 0x2f0   : > { %v865_v24 = vmul.f32 1.442695, %v864_v23 }
 0x2f2   : > { %1344 = vpow2.f32 %v865_v24 }
 0x2f4   : > { %v1343_v25 = vpop.eup %1342 }
 0x2f5   : > { %v975_v26 = vpop.xlane.xlu0 %974  ;;  %v754_v27 = vsel %vm634_vm3, %v1343_v25, 0.0 }
 0x2f6   : > { %v976_v28 = vsub.f32 %v972_v11, %v975_v26  ;;  %755 = vadd.xlane.f32.xlu0 %v754_v27 }
 0x2f8   : > { %v977_v29 = vmul.f32 1.442695, %v976_v28 }
 0x2fa   : > { %1346 = vpow2.f32 %v977_v29 }
 0x2fc   : > { %v1345_v30 = vpop.eup %1344 }
 0x2fd   : > { %v867_v31 = vsel %vm634_vm3, %v1345_v30, 0.0 }
 0x2fe   : > { %868 = vadd.xlane.f32.xlu1 %v867_v31 }
 0x304   : > { %v1347_v32 = vpop.eup %1346 }
 0x305   : > { %v979_v33 = vsel %vm634_vm3, %v1347_v32, 0.0 }
 0x306   : > { %980 = vadd.xlane.f32.xlu0 %v979_v33 }
 0x30f   : > { %985 = vrot.lane.b32.xlu1 %v1541_v51, %s1384_s30 }
 0x311   : > { %v643_v34 = vpop.xlane.xlu1 %642 }
 0x312   : > { %1348 = vrcp.f32 %v643_v34 }
 0x315   : > { %v762_v36 = vpop.permute.xlu1 %761 }
 0x316   : > { %v767_v39 = vsel %vm650_vm4, %v762_v36, 0 }
 0x31c   : > { %v1349_v35 = vpop.eup %1348  ;;  %873 = vrot.lane.b32.xlu0 %v1541_v51, %s1382_s28 }
 0x31d   : > { %v645_v37 = vmul.f32 %v1349_v35, %v1341_v17 }
 0x31f   : > { %v646_v38 = vpack.c.bf16 %v645_v37, %v645_v37 }
 0x321   : > { %1266 = vmatmul.mubr.msk.bf16.vlgmr.msra.gmra.mrb[8].mxu0 %vm634_vm3, %v646_v38 }
 0x322   : > { %1276 = vmatpush3.bf16.msra.mxu0 %v767_v39  ;;  %1277 = vmatprep.mubr.msk.bf16.mxu0 %vm1381_vm0, %v1380_v13 }
 0x323   : > { %1287 = vmatprep.subr.bf16.mxu0 %v1380_v13 }
 0x383   : > { %v756_v40 = vpop.xlane.xlu0 %755 }
 0x384   : > { %1350 = vrcp.f32 %v756_v40 }
 0x38b   : > { %v869_v41 = vpop.xlane.xlu1 %868 }
 0x38c   : > { %1352 = vrcp.f32 %v869_v41 }
 0x38e   : > { %v1351_v42 = vpop.eup %1350 }
 0x38f   : > { %v758_v43 = vmul.f32 %v1351_v42, %v1343_v25  ;;  %v986_v50 = vpop.permute.xlu1 %985 }
 0x390   : > { %v991_v52 = vsel %vm650_vm4, %v986_v50, 0 }
 0x391   : > { %v759_v44 = vpack.c.bf16 %v758_v43, %v758_v43 }
 0x393   : > { %v981_v45 = vpop.xlane.xlu0 %980  ;;  %1278 = vmatmul.mubr.msk.bf16.vlgmr.msra.gmra.mrb[12].mxu0 %vm634_vm3, %v759_v44 }
 0x394   : > { %1354 = vrcp.f32 %v981_v45  ;;  %1289 = vmatprep.mubr.msk.bf16.mxu0 %vm1381_vm0, %v1380_v13 }
 0x396   : > { %v1353_v46 = vpop.eup %1352 }
 0x397   : > { %v871_v47 = vmul.f32 %v1353_v46, %v1345_v30  ;;  %v874_v48 = vpop.permute.xlu0 %873 }
 0x398   : > { %v879_v49 = vsel %vm650_vm4, %v874_v48, 0 }
 0x399   : > { %1288 = vmatpush3.bf16.msra.mxu0 %v879_v49  ;;  %v872_v51 = vpack.c.bf16 %v871_v47, %v871_v47 }
 0x39a   : > { %1299 = vmatprep.subr.bf16.mxu0 %v1380_v13 }
 0x39c   : > { %1290 = vmatmul.mubr.msk.bf16.vlgmr.msra.gmra.mrb[16].mxu0 %vm634_vm3, %v872_v51 }
 0x39d   : > { %1300 = vmatpush3.bf16.msra.mxu0 %v991_v52  ;;  %1301 = vmatprep.mubr.msk.bf16.mxu0 %vm1381_vm0, %v1380_v13 }
 0x39e   : > { %v1355_v53 = vpop.eup %1354 }
 0x39f   : > { %v983_v54 = vmul.f32 %v1355_v53, %v1347_v32 }
 0x3a1   : > { %v984_v55 = vpack.c.bf16 %v983_v54, %v983_v54 }
 0x3a4   : > { %1302 = vmatmul.mubr.msk.bf16.vlgmr.msra.gmra.mrb[20].mxu0 %vm634_vm3, %v984_v55 }
 0x3f4   : > { %v688_v56 = vpop.f32.mrb[8].mxu0 }
 0x3f5   : > { %v1267_v57 = vpop.f32.mrb[9].mxu0 }
 0x3f6   : > { %v691_v58 = vpop.f32.mrb[10].mxu0 }
 0x3f7   : > { %v1268_v59 = vpop.f32.mrb[11].mxu0 }
 0x466   : > { %v803_v60 = vpop.f32.mrb[12].mxu0 }
 0x467   : > { %1034 = vrot.lane.b32.xlu1 %v803_v60, %s1384_s30  ;;  %v1279_v61 = vpop.f32.mrb[13].mxu0 }
 0x468   : > { %v806_v62 = vpop.f32.mrb[14].mxu0 }
 0x469   : > { %v1280_v63 = vpop.f32.mrb[15].mxu0 }
 0x46f   : > { %v915_v0 = vpop.f32.mrb[16].mxu0 }
 0x470   : > { %1038 = vrot.lane.b32.xlu0 %v915_v0, %s1382_s28  ;;  %v1291_v13 = vpop.f32.mrb[17].mxu0 }
 0x471   : > { %v918_v1 = vpop.f32.mrb[18].mxu0 }
 0x472   : > { %v1292_v2 = vpop.f32.mrb[19].mxu0 }
 0x477   : > { %v1027_v3 = vpop.f32.mrb[20].mxu0 }
 0x478   : > { %1042 = vrot.lane.b32.xlu1 %v1027_v3, %s1383_s29  ;;  %v1303_v4 = vpop.f32.mrb[21].mxu0 }
 0x479   : > { %v1030_v5 = vpop.f32.mrb[22].mxu0 }
 0x47a   : > { %v1304_v6 = vpop.f32.mrb[23].mxu0 }
 0x4d9   : > { %v1035_v7 = vpop.permute.xlu1 %1034 }
 0x4da   : > { %v1045_v9 = vsel %vm422_vm1, %v688_v56, %v1035_v7 }
 0x4e2   : > { %v1039_v8 = vpop.permute.xlu0 %1038 }
 0x4e3   : > { %v1047_v10 = vsel %vm1046_vm5, %v1045_v9, %v1039_v8 }
 0x4ea   : > { %v1043_v11 = vpop.permute.xlu1 %1042 }
 0x4eb   : > { %v1049_v12 = vsel %vm1048_vm6, %v1047_v10, %v1043_v11 }
 0x4ec   : > { %v1050_v14 = vpack.c.bf16 %v1049_v12, %v1049_v12 }
 0x4ee   : > { %1051 = vst [vmem:[%s403_s7] sm:$0xf] %v1050_v14 }
 0x4ef PF: > { %s14_s17 = sadd.s32 1, %s1378_s17   ;;  %s1602_s15 = smov %s1374_s16 }
 0x4f0   : > { %p11_p6 = scmp.ge.s32.totalorder %s14_s17, 4   ;;  %s1603_s16 = smov %s1605_s19 }
 0x4f2   :  { %13 = sbr.rel (!%p11_p6) target bundleno = 2 (0x2), region = 204 }

// kernel: gtransformer_forward.9
= control target key start
LH: loop header
LB: loop body
LE: loop exit
PB: predicated region body
PF: predicated region fallthrough
CT: control target
= control target key end

     0   :  { %v359_v0 = vmov 0.0   ;;  %vm360_vm0 = vmmov 0   ;;  %vm57_vm1 = vcmask 261120   ;;  %vm274_vm2 = vcmask 257024   ;;  %s457_s1 = inlined_call_operand.vmem [shape: bf16[32,128], index: 1, kind: input, shape index: {}]   ;;  %s458_s0 = inlined_call_operand.vmem [shape: bf16[16,32], index: 0, kind: input, shape index: {}]   ;;  %s459_s3 = inlined_call_operand.vmem [shape: bf16[128,32], index: 3, kind: input, shape index: {}]   ;;  %s460_s2 = inlined_call_operand.vmem [shape: f32[1,128], index: 2, kind: input, shape index: {}]   ;;  %s461_s4 = inlined_call_operand.vmem [shape: f32[1,32], index: 4, kind: input, shape index: {}]   ;;  %s462_s5 = inlined_call_operand.vmem [shape: f32[1,32], index: 5, kind: input, shape index: {}]   ;;  %s463_s6 = inlined_call_operand.vmem [shape: f32[1,32], index: 6, kind: input, shape index: {}]   ;;  %s464_s7 = inlined_call_operand.vmem [shape: bf16[16,32], index: 7, kind: output, shape index: {}]  }
   0x1   :  { %313 = vmatprep.subr.bf16.mxu0 %v359_v0  ;;  %v343_v1 = vld [vmem:[%s457_s1] sm:$0xff]   ;;  %317 = vmatprep.mubr.msk.bf16.mxu0 %vm360_vm0, %v359_v0  ;;  %v344_v2 = vld [vmem:[%s457_s1 + $0x8] sm:$0xff]   ;;  %v348_v6 = vld [vmem:[%s459_s3 + $0x10] sm:$0xff]  }
   0x2   :  { %321 = vmatprep.subr.bf16.mxu1 %v359_v0  ;;  %337 = vmatprep.mubr.msk.bf16.mxu1 %vm360_vm0, %v359_v0  ;;  %v27_v3 = vld [vmem:[%s458_s0] sm:$0xff]   ;;  %v347_v5 = vld [vmem:[%s459_s3 + $0x8] sm:$0xff]   ;;  %v349_v7 = vld [vmem:[%s459_s3 + $0x18] sm:$0xff]  }
   0x3   :  { %314 = vmatpush3.bf16.msra.mxu0 %v343_v1  ;;  %v346_v4 = vld [vmem:[%s459_s3] sm:$0xff]   ;;  %v351_v9 = vld [vmem:[%s459_s3 + $0x28] sm:$0xff]   ;;  %v352_v10 = vld [vmem:[%s459_s3 + $0x30] sm:$0xff]   ;;  %v217_v23 = vunpack.c.l.bf16 %v27_v3  ;;  %v218_v27 = vunpack.c.h.bf16 %v27_v3 }
   0x4   :  { %315 = vmatprep.subr.bf16.mxu0 %v359_v0  ;;  %322 = vmatpush3.bf16.msra.mxu1 %v346_v4  ;;  %v350_v8 = vld [vmem:[%s459_s3 + $0x20] sm:$0xff]   ;;  %v353_v11 = vld [vmem:[%s459_s3 + $0x38] sm:$0xff]  }
   0x5   :  { %323 = vmatprep.subr.bf16.mxu1 %v359_v0  ;;  %v281_v12 = vld [vmem:[%s460_s2] ss:$0 sm:$0xff] }
   0x6   :  { %v286_v22 = vld [vmem:[%s461_s4] ss:$0 sm:$0xff] }
   0x7   :  { %316 = vmatpush3.bf16.msra.mxu0 %v344_v2  ;;  %v295_v52 = vld [vmem:[%s462_s5] ss:$0 sm:$0xff] }
   0x8   :  { %324 = vmatpush3.bf16.msra.mxu1 %v347_v5  ;;  %v296_v54 = vld [vmem:[%s463_s6] ss:$0 sm:$0xff] }
   0x9   :  { %325 = vmatprep.subr.bf16.mxu1 %v359_v0 }
   0xa   :  { %318 = vmatmul.mubr.msk.bf16.vlgmr.msra.gmra.mrb[0].mxu0 %vm57_vm1, %v27_v3 }
   0xc   :  { %326 = vmatpush3.bf16.msra.mxu1 %v348_v6 }
   0xd   :  { %327 = vmatprep.subr.bf16.mxu1 %v359_v0 }
  0x10   :  { %328 = vmatpush3.bf16.msra.mxu1 %v349_v7 }
  0x11   :  { %329 = vmatprep.subr.bf16.mxu1 %v359_v0 }
  0x14   :  { %330 = vmatpush3.bf16.msra.mxu1 %v350_v8 }
  0x15   :  { %331 = vmatprep.subr.bf16.mxu1 %v359_v0 }
  0x18   :  { %332 = vmatpush3.bf16.msra.mxu1 %v351_v9 }
  0x19   :  { %333 = vmatprep.subr.bf16.mxu1 %v359_v0 }
  0x1c   :  { %334 = vmatpush3.bf16.msra.mxu1 %v352_v10 }
  0x1d   :  { %335 = vmatprep.subr.bf16.mxu1 %v359_v0 }
  0x20   :  { %336 = vmatpush3.bf16.msra.mxu1 %v353_v11 }
  0xdd   :  { %v95_v13 = vpop.f32.mrb[0].mxu0 }
  0xde   :  { %v96_v14 = vadd.f32 %v281_v12, %v95_v13  ;;  %v319_v15 = vpop.f32.mrb[1].mxu0 }
  0xdf   :  { %v98_v16 = vpop.f32.mrb[2].mxu0 }
  0xe0   :  { %v99_v17 = vadd.f32 %v281_v12, %v98_v16  ;;  %v320_v18 = vpop.f32.mrb[3].mxu0  ;;  %v102_v19 = vmax.f32 %v96_v14, 0.0 }
  0xe2   :  { %v103_v20 = vmax.f32 %v99_v17, 0.0 }
  0xe4   :  { %v104_v21 = vpack.c.bf16 %v103_v20, %v102_v19 }
  0xe6   :  { %338 = vmatmul.mubr.bf16.vlgmr.msra.gmra.mrb[0].mxu1 %v104_v21 }
 0x1b9   :  { %v210_v24 = vpop.f32.mrb[0].mxu1 }
 0x1ba   :  { %v211_v25 = vadd.f32 %v286_v22, %v210_v24  ;;  %v339_v26 = vpop.f32.mrb[1].mxu1 }
 0x1bb   :  { %v213_v28 = vpop.f32.mrb[2].mxu1 }
 0x1bc   :  { %v214_v29 = vadd.f32 %v286_v22, %v213_v28  ;;  %v340_v30 = vpop.f32.mrb[3].mxu1  ;;  %v219_v31 = vadd.f32 %v217_v23, %v211_v25 }
 0x1be   :  { %v221_v32 = vsel %vm57_vm1, %v219_v31, 0.0  ;;  %v220_v33 = vadd.f32 %v218_v27, %v214_v29 }
 0x1bf   :  { %222 = vadd.xlane.f32.xlu0 %v221_v32 }
 0x1c0   :  { %v224_v34 = vsel %vm57_vm1, %v220_v33, 0.0 }
 0x1c3   :  { %225 = vadd.xlane.f32.xlu0 %v224_v34 }
 0x24c   :  { %v223_v35 = vpop.xlane.xlu0 %222 }
 0x24d   :  { %v228_v36 = vmul.f32 0.03125, %v223_v35 }
 0x24f   :  { %v230_v37 = vsub.f32 %v219_v31, %v228_v36 }
 0x250   :  { %v226_v38 = vpop.xlane.xlu0 %225 }
 0x251   :  { %v229_v39 = vmul.f32 0.03125, %v226_v38  ;;  %v232_v40 = vmul.f32 %v230_v37, %v230_v37 }
 0x253   :  { %v231_v41 = vsub.f32 %v220_v33, %v229_v39  ;;  %v234_v42 = vsel %vm57_vm1, %v232_v40, 0.0 }
 0x254   :  { %235 = vadd.xlane.f32.xlu1 %v234_v42 }
 0x255   :  { %v233_v43 = vmul.f32 %v231_v41, %v231_v41 }
 0x257   :  { %v237_v44 = vsel %vm57_vm1, %v233_v43, 0.0 }
 0x258   :  { %238 = vadd.xlane.f32.xlu1 %v237_v44 }
 0x2e1   :  { %v236_v45 = vpop.xlane.xlu1 %235 }
 0x2e2   :  { %v240_v46 = vmul.f32 0.03125, %v236_v45 }
 0x2e4   :  { %v242_v47 = vadd.f32 1e-05, %v240_v46 }
 0x2e5   :  { %v239_v48 = vpop.xlane.xlu1 %238 }
 0x2e6   :  { %355 = vrsqrt.f32 %v242_v47  ;;  %v241_v49 = vmul.f32 0.03125, %v239_v48 }
 0x2e8   :  { %v243_v50 = vadd.f32 1e-05, %v241_v49 }
 0x2ea   :  { %357 = vrsqrt.f32 %v243_v50 }
 0x2f0   :  { %v356_v51 = vpop.eup %355 }
 0x2f1   :  { %v246_v53 = vmul.f32 %v356_v51, %v230_v37 }
 0x2f3   :  { %v255_v55 = vmul.f32 %v295_v52, %v246_v53 }
 0x2f4   :  { %v358_v56 = vpop.eup %357 }
 0x2f5   :  { %v264_v57 = vadd.f32 %v296_v54, %v255_v55  ;;  %v247_v58 = vmul.f32 %v358_v56, %v231_v41 }
 0x2f7   :  { %v299_v59 = vpack.c.bf16 %v264_v57, %v264_v57  ;;  %v256_v60 = vmul.f32 %v295_v52, %v247_v58 }
 0x2f9   :  { %275 = vst.msk [vmem:[%s464_s7] sm:$0xf] %vm274_vm2, %v299_v59  ;;  %v265_v61 = vadd.f32 %v296_v54, %v256_v60 }
 0x2fb   :  { %v300_v62 = vpack.c.bf16 %v265_v61, %v265_v61 }
 0x2fd   :  { %276 = vst.msk [vmem:[%s464_s7 + $0x4] sm:$0xf] %vm274_vm2, %v300_v62 }

</bundles_post_ra>
